<compile_context>
chip_gen: v5e
topology: v5e:2x2
jax: 0.10.0
libtpu: 0.0.40
codegen_flags: <defaults>
</compile_context>

<pallas_src>
import functools

import jax
import jax.numpy as jnp
from jax.experimental import pallas as pl
from jax.experimental.pallas import tpu as pltpu


def _round_up(x, m):
    return ((x + m - 1) // m) * m


def _tree_max(vals):
    """Pairwise-tree maximum over a list of equal-shape arrays."""
    while len(vals) > 1:
        nxt = [jnp.maximum(vals[i], vals[i + 1]) for i in range(0, len(vals) - 1, 2)]
        if len(vals) % 2:
            nxt.append(vals[-1])
        vals = nxt
    return vals[0]


def qmix_kernel(inp_ref, ws_ref, bsb_ref, w2a_ref, b2a_ref,
                wn1_ref, bn1_ref, wn2_ref, bn2_ref,
                wn3_ref, wv2_ref, bout_ref,
                out_ref, att_ref, *, n_agents, heads, hyper):
    # Transposed layout: batch lives on the lane (last) axis everywhere.
    inp = inp_ref[...]                        # (n_agents + state_dim, TB), one DMA
    aq = inp[:n_agents, :]                    # (n_agents, TB)
    st = inp[n_agents:, :]                    # (state_dim, TB)

    # ---- fused "states" matmul: rows [0:hyper] = hypernet hidden, [hyper:] = V-net hidden ----
    hs = jnp.dot(ws_ref[...], st, preferred_element_type=jnp.float32) + bsb_ref[...]
    hs = jnp.maximum(hs, 0.0)                 # (hyper + heads, TB)
    h_att = hs[:hyper, :]                     # (hyper, TB)

    # ---- V head immediately: only a (1, TB) value stays live, not (heads, TB) ----
    vs = jnp.dot(wv2_ref[...], hs[hyper:, :], preferred_element_type=jnp.float32)  # (1, TB)

    # ---- attention logits into VMEM scratch (row = a*heads + h, matching torch reshape) ----
    att_ref[...] = (jnp.dot(w2a_ref[...], h_att, preferred_element_type=jnp.float32)
                    + b2a_ref[...])           # (n_agents*heads, TB)

    # ---- softmax over agents + mix with agent_qs; ref-sliced, two short passes ----
    m = _tree_max([att_ref[a * heads:(a + 1) * heads, :] for a in range(n_agents)])
    denom = jnp.zeros_like(m)
    mixed = jnp.zeros_like(m)
    for a in range(n_agents):
        e = jnp.exp(att_ref[a * heads:(a + 1) * heads, :] - m)
        denom = denom + e
        mixed = mixed + aq[a:a + 1, :] * e
    mixed = mixed * pl.reciprocal(denom, approx=False)   # (heads, TB)

    # ---- advantage net: Linear -> ReLU -> Linear -> ReLU ----
    x = jnp.maximum(
        jnp.dot(wn1_ref[...], mixed, preferred_element_type=jnp.float32) + bn1_ref[...], 0.0)
    x = jnp.maximum(
        jnp.dot(wn2_ref[...], x, preferred_element_type=jnp.float32) + bn2_ref[...], 0.0)

    # ---- output: advs + vs + (bn3 + bv2), lane-dense (1, TB) store ----
    out_ref[...] = (jnp.dot(wn3_ref[...], x, preferred_element_type=jnp.float32)
                    + vs + bout_ref[...])


def pack_params(params):
    """Transpose / fuse torch-oriented (in, out) weights into kernel (out, in) tensors."""
    ws_T = jnp.concatenate([params["w1a"], params["wv1"]], axis=1).T     # (hyper+heads, state_dim)
    bsb = jnp.concatenate([params["b1a"], params["bv1"]], axis=1).T      # (hyper+heads, 1)
    w2a_T = params["w2a"].T                                              # (n_agents*heads, hyper)
    b2a = params["b2a"].T                                                # (n_agents*heads, 1)
    wn1_T = params["wn1"].T                                              # (heads, heads)
    bn1 = params["bn1"].T
    wn2_T = params["wn2"].T
    bn2 = params["bn2"].T
    wn3_T = params["wn3"].T                                              # (1, heads)
    wv2_T = params["wv2"].T                                              # (1, heads)
    bout = (params["bn3"] + params["bv2"]).T                             # (1, 1)
    return [ws_T, bsb, w2a_T, b2a, wn1_T, bn1, wn2_T, bn2, wn3_T, wv2_T, bout]


def qmixer_forward(agent_qs, states, params, *, n_agents, central_action_embed,
                   embed_dim, tile_b=2048):
    """Matches QMixer.forward: returns q_tot with shape (bs, T, 1)."""
    assert central_action_embed == 1
    bs = agent_qs.shape[0]
    heads = embed_dim
    state_dim = params["w1a"].shape[0]
    hyper = params["w1a"].shape[1]
    # Sublane-aligned agent/hidden slices inside the kernel:
    assert heads % 8 == 0 and hyper % 8 == 0

    aq2 = agent_qs.reshape(-1, n_agents).astype(jnp.float32)             # (B, n_agents)
    st2 = states.reshape(-1, state_dim).astype(jnp.float32)              # (B, state_dim)
    B = st2.shape[0]
    feat = n_agents + state_dim

    # One fused concat+cast+transpose pass (no pad, no separate .T per array): batch becomes
    # the lane axis and each grid step gets a single input DMA.
    inp_T = jnp.concatenate([aq2, st2], axis=1).T                        # (feat, B)

    # Tile choice: big tiles amortize per-step overhead; cap so v7x's 2 TCs both get a step
    # when B allows. Ragged last tile: padded lanes compute garbage that never crosses lanes,
    # and the OOB part of the output store is dropped.
    eff_tile = int(min(tile_b, max(128, _round_up(pl.cdiv(B, 2), 128))))
    num_tiles = pl.cdiv(B, eff_tile)

    packed = pack_params(params)

    in_specs = [pl.BlockSpec((feat, eff_tile), lambda i: (0, i))] + [
        pl.BlockSpec(w.shape, lambda i: (0, 0)) for w in packed]         # weights stay resident
    out_specs = pl.BlockSpec((1, eff_tile), lambda i: (0, i))

    flops_per_elt = (2 * state_dim * (hyper + heads)        # fused state matmul
                     + 2 * hyper * (n_agents * heads)       # attention logits
                     + 6 * n_agents * heads                 # softmax + mix
                     + 4 * heads * heads                    # advantage net
                     + 4 * heads)                           # output heads
    cost = pl.CostEstimate(
        flops=int(B * flops_per_elt),
        transcendentals=int(B * (n_agents + 1) * heads),
        bytes_accessed=int(4 * (B * (feat + 1) + sum(int(w.size) for w in packed))))

    kernel = functools.partial(qmix_kernel, n_agents=n_agents, heads=heads, hyper=hyper)

    y = pl.pallas_call(
        kernel,
        out_shape=jax.ShapeDtypeStruct((1, B), jnp.float32),
        grid_spec=pltpu.PrefetchScalarGridSpec(
            num_scalar_prefetch=0,
            grid=(num_tiles,),
            in_specs=in_specs,
            out_specs=out_specs,
            scratch_shapes=[pltpu.VMEM((n_agents * heads, eff_tile), jnp.float32)],
        ),
        compiler_params=pltpu.CompilerParams(
            dimension_semantics=("parallel",),
            vmem_limit_bytes=32 * 1024 * 1024,   # raises v5e's 16 MiB default scope
        ),
        cost_estimate=cost,
    )(inp_T, *packed)

    return y[0, :].reshape(bs, -1, 1)


def qmixer_reference(agent_qs, states, params, *, n_agents, central_action_embed, embed_dim):
    """Pure-JAX reference mirroring the torch forward exactly."""
    bs = agent_qs.shape[0]
    heads = embed_dim
    state_dim = params["w1a"].shape[0]
    states_f = states.reshape(-1, state_dim)
    aq = agent_qs.reshape(-1, central_action_embed, n_agents)

    h = jnp.maximum(states_f @ params["w1a"] + params["b1a"], 0.0)
    att = h @ params["w2a"] + params["b2a"]
    att = att.reshape(-1, n_agents, heads)
    att = jax.nn.softmax(att, axis=1)

    inputs = jnp.einsum("bca,bah->bch", aq, att).reshape(-1, heads)

    x = jnp.maximum(inputs @ params["wn1"] + params["bn1"], 0.0)
    x = jnp.maximum(x @ params["wn2"] + params["bn2"], 0.0)
    advs = x @ params["wn3"] + params["bn3"]

    v = jnp.maximum(states_f @ params["wv1"] + params["bv1"], 0.0)
    vs = v @ params["wv2"] + params["bv2"]

    return (advs + vs).reshape(bs, -1, 1)


def init_params(key, *, state_dim, hypernet_embed, n_agents, embed_dim):
    heads = embed_dim
    ks = jax.random.split(key, 7)

    def lin(k, fan_in, fan_out):
        w = jax.random.normal(k, (fan_in, fan_out), jnp.float32) * 0.1
        b = jnp.full((1, fan_out), 0.01, jnp.float32)
        return w, b

    w1a, b1a = lin(ks[0], state_dim, hypernet_embed)
    w2a, b2a = lin(ks[1], hypernet_embed, heads * n_agents)
    wn1, bn1 = lin(ks[2], embed_dim, embed_dim)
    wn2, bn2 = lin(ks[3], embed_dim, embed_dim)
    wn3, bn3 = lin(ks[4], embed_dim, 1)
    wv1, bv1 = lin(ks[5], state_dim, embed_dim)
    wv2, bv2 = lin(ks[6], embed_dim, 1)
    return dict(w1a=w1a, b1a=b1a, w2a=w2a, b2a=b2a,
                wn1=wn1, bn1=bn1, wn2=wn2, bn2=bn2, wn3=wn3, bn3=bn3,
                wv1=wv1, bv1=bv1, wv2=wv2, bv2=bv2)


if __name__ == "__main__":
    # Small, forward-consistent config:
    bs, T = 2, 4
    n_agents = 8
    state_dim = 32          # state_shape = (32,)
    central_action_embed = 1
    embed_dim = 32          # mixing_embed_dim == heads
    hypernet_embed = 64

    key = jax.random.PRNGKey(0)
    k_aq, k_st, k_p = jax.random.split(key, 3)

    agent_qs = jax.random.normal(k_aq, (bs, T, n_agents), jnp.float32)
    states = jax.random.normal(k_st, (bs, T, state_dim), jnp.float32)
    params = init_params(k_p, state_dim=state_dim, hypernet_embed=hypernet_embed,
                         n_agents=n_agents, embed_dim=embed_dim)

    q_tot = qmixer_forward(agent_qs, states, params,
                           n_agents=n_agents,
                           central_action_embed=central_action_embed,
                           embed_dim=embed_dim,
                           tile_b=2048)
    q_tot = jax.block_until_ready(q_tot)

    q_ref = qmixer_reference(agent_qs, states, params,
                             n_agents=n_agents,
                             central_action_embed=central_action_embed,
                             embed_dim=embed_dim)

    assert q_tot.shape == (bs, T, 1)
    assert jnp.allclose(q_tot, q_ref, atol=1e-4, rtol=1e-4)
    print("KERNEL_OK")
</pallas_src>

<mosaic_0001>
module attributes {stable_mosaic.version = 11 : i64} {
  func.func @qmix_kernel(%arg0: i32, %arg1: memref<40x128xf32, #tpu.memory_space<vmem>>, %arg2: memref<96x32xf32, #tpu.memory_space<vmem>>, %arg3: memref<96x1xf32, #tpu.memory_space<vmem>>, %arg4: memref<256x64xf32, #tpu.memory_space<vmem>>, %arg5: memref<256x1xf32, #tpu.memory_space<vmem>>, %arg6: memref<32x32xf32, #tpu.memory_space<vmem>>, %arg7: memref<32x1xf32, #tpu.memory_space<vmem>>, %arg8: memref<32x32xf32, #tpu.memory_space<vmem>>, %arg9: memref<32x1xf32, #tpu.memory_space<vmem>>, %arg10: memref<1x32xf32, #tpu.memory_space<vmem>>, %arg11: memref<1x32xf32, #tpu.memory_space<vmem>>, %arg12: memref<1x1xf32, #tpu.memory_space<vmem>>, %arg13: memref<1x128xf32, #tpu.memory_space<vmem>>, %arg14: memref<256x128xf32, #tpu.memory_space<vmem>>) attributes {dimension_semantics = [#tpu.dimension_semantics<parallel>], iteration_bounds = array<i64: 1>, scalar_prefetch = 0 : i64, scratch_operands = 1 : i64, tpu.core_type = #tpu.core_type<tc>, window_params = [{transform_indices = @transform_0, window_bounds = array<i64: 40, 128>}, {pipeline_mode = #tpu.pipeline_mode<synchronous>, transform_indices = @transform_1, window_bounds = array<i64: 96, 32>}, {pipeline_mode = #tpu.pipeline_mode<synchronous>, transform_indices = @transform_2, window_bounds = array<i64: 96, 1>}, {pipeline_mode = #tpu.pipeline_mode<synchronous>, transform_indices = @transform_3, window_bounds = array<i64: 256, 64>}, {pipeline_mode = #tpu.pipeline_mode<synchronous>, transform_indices = @transform_4, window_bounds = array<i64: 256, 1>}, {pipeline_mode = #tpu.pipeline_mode<synchronous>, transform_indices = @transform_5, window_bounds = array<i64: 32, 32>}, {pipeline_mode = #tpu.pipeline_mode<synchronous>, transform_indices = @transform_6, window_bounds = array<i64: 32, 1>}, {pipeline_mode = #tpu.pipeline_mode<synchronous>, transform_indices = @transform_7, window_bounds = array<i64: 32, 32>}, {pipeline_mode = #tpu.pipeline_mode<synchronous>, transform_indices = @transform_8, window_bounds = array<i64: 32, 1>}, {pipeline_mode = #tpu.pipeline_mode<synchronous>, transform_indices = @transform_9, window_bounds = array<i64: 1, 32>}, {pipeline_mode = #tpu.pipeline_mode<synchronous>, transform_indices = @transform_10, window_bounds = array<i64: 1, 32>}, {pipeline_mode = #tpu.pipeline_mode<synchronous>, transform_indices = @transform_11, window_bounds = array<i64: 1, 1>}, {transform_indices = @transform_12, window_bounds = array<i64: 1, 128>}]} {
    %c0 = arith.constant 0 : index
    %c0_0 = arith.constant 0 : index
    %0 = vector.load %arg1[%c0, %c0_0] : memref<40x128xf32, #tpu.memory_space<vmem>>, vector<40x128xf32>
    %1 = vector.extract_strided_slice %0 {offsets = [0, 0], sizes = [8, 128], strides = [1, 1]} : vector<40x128xf32> to vector<8x128xf32>
    %2 = vector.extract_strided_slice %0 {offsets = [8, 0], sizes = [32, 128], strides = [1, 1]} : vector<40x128xf32> to vector<32x128xf32>
    %c0_1 = arith.constant 0 : index
    %c0_2 = arith.constant 0 : index
    %3 = vector.load %arg2[%c0_1, %c0_2] : memref<96x32xf32, #tpu.memory_space<vmem>>, vector<96x32xf32>
    %cst = arith.constant dense<0.000000e+00> : vector<96x128xf32>
    %4 = tpu.matmul %3, %2, %cst {dimension_numbers = #tpu.dot_dimension_numbers<[1], [0], [0], [1], [0, 0, 1, 1], [], []>} : vector<96x32xf32>, vector<32x128xf32>, vector<96x128xf32> -> vector<96x128xf32>
    %c0_3 = arith.constant 0 : index
    %c0_4 = arith.constant 0 : index
    %5 = vector.load %arg3[%c0_3, %c0_4] : memref<96x1xf32, #tpu.memory_space<vmem>>, vector<96x1xf32>
    %6 = vector.broadcast %5 : vector<96x1xf32> to vector<96x128xf32>
    %7 = arith.addf %4, %6 : vector<96x128xf32>
    %cst_5 = arith.constant 0.000000e+00 : f32
    %8 = vector.broadcast %cst_5 : f32 to vector<96x128xf32>
    %9 = arith.maximumf %7, %8 : vector<96x128xf32>
    %10 = vector.extract_strided_slice %9 {offsets = [0, 0], sizes = [64, 128], strides = [1, 1]} : vector<96x128xf32> to vector<64x128xf32>
    %c0_6 = arith.constant 0 : index
    %c0_7 = arith.constant 0 : index
    %11 = vector.load %arg11[%c0_6, %c0_7] : memref<1x32xf32, #tpu.memory_space<vmem>>, vector<1x32xf32>
    %12 = vector.extract_strided_slice %9 {offsets = [64, 0], sizes = [32, 128], strides = [1, 1]} : vector<96x128xf32> to vector<32x128xf32>
    %cst_8 = arith.constant dense<0.000000e+00> : vector<1x128xf32>
    %13 = tpu.matmul %11, %12, %cst_8 {dimension_numbers = #tpu.dot_dimension_numbers<[1], [0], [0], [1], [0, 0, 1, 1], [], []>} : vector<1x32xf32>, vector<32x128xf32>, vector<1x128xf32> -> vector<1x128xf32>
    %c0_9 = arith.constant 0 : index
    %c0_10 = arith.constant 0 : index
    %14 = vector.load %arg4[%c0_9, %c0_10] : memref<256x64xf32, #tpu.memory_space<vmem>>, vector<256x64xf32>
    %cst_11 = arith.constant dense<0.000000e+00> : vector<256x128xf32>
    %15 = tpu.matmul %14, %10, %cst_11 {dimension_numbers = #tpu.dot_dimension_numbers<[1], [0], [0], [1], [0, 0, 1, 1], [], []>} : vector<256x64xf32>, vector<64x128xf32>, vector<256x128xf32> -> vector<256x128xf32>
    %c0_12 = arith.constant 0 : index
    %c0_13 = arith.constant 0 : index
    %16 = vector.load %arg5[%c0_12, %c0_13] : memref<256x1xf32, #tpu.memory_space<vmem>>, vector<256x1xf32>
    %17 = vector.broadcast %16 : vector<256x1xf32> to vector<256x128xf32>
    %18 = arith.addf %15, %17 : vector<256x128xf32>
    %c0_14 = arith.constant 0 : index
    %c0_15 = arith.constant 0 : index
    %19 = vector.load %arg14[%c0_14, %c0_15] : memref<256x128xf32, #tpu.memory_space<vmem>>, vector<256x128xf32>
    tpu.vector_store %arg14[%c0_14, %c0_15], %18 {strides = array<i32>} : memref<256x128xf32, #tpu.memory_space<vmem>>, vector<256x128xf32>,
    %c0_16 = arith.constant 0 : index
    %c0_17 = arith.constant 0 : index
    %20 = vector.load %arg14[%c0_16, %c0_17] : memref<256x128xf32, #tpu.memory_space<vmem>>, vector<32x128xf32>
    %c32 = arith.constant 32 : index
    %c0_18 = arith.constant 0 : index
    %21 = vector.load %arg14[%c32, %c0_18] : memref<256x128xf32, #tpu.memory_space<vmem>>, vector<32x128xf32>
    %c64 = arith.constant 64 : index
    %c0_19 = arith.constant 0 : index
    %22 = vector.load %arg14[%c64, %c0_19] : memref<256x128xf32, #tpu.memory_space<vmem>>, vector<32x128xf32>
    %c96 = arith.constant 96 : index
    %c0_20 = arith.constant 0 : index
    %23 = vector.load %arg14[%c96, %c0_20] : memref<256x128xf32, #tpu.memory_space<vmem>>, vector<32x128xf32>
    %c128 = arith.constant 128 : index
    %c0_21 = arith.constant 0 : index
    %24 = vector.load %arg14[%c128, %c0_21] : memref<256x128xf32, #tpu.memory_space<vmem>>, vector<32x128xf32>
    %c160 = arith.constant 160 : index
    %c0_22 = arith.constant 0 : index
    %25 = vector.load %arg14[%c160, %c0_22] : memref<256x128xf32, #tpu.memory_space<vmem>>, vector<32x128xf32>
    %c192 = arith.constant 192 : index
    %c0_23 = arith.constant 0 : index
    %26 = vector.load %arg14[%c192, %c0_23] : memref<256x128xf32, #tpu.memory_space<vmem>>, vector<32x128xf32>
    %c224 = arith.constant 224 : index
    %c0_24 = arith.constant 0 : index
    %27 = vector.load %arg14[%c224, %c0_24] : memref<256x128xf32, #tpu.memory_space<vmem>>, vector<32x128xf32>
    %28 = arith.maximumf %20, %21 : vector<32x128xf32>
    %29 = arith.maximumf %22, %23 : vector<32x128xf32>
    %30 = arith.maximumf %24, %25 : vector<32x128xf32>
    %31 = arith.maximumf %26, %27 : vector<32x128xf32>
    %32 = arith.maximumf %28, %29 : vector<32x128xf32>
    %33 = arith.maximumf %30, %31 : vector<32x128xf32>
    %34 = arith.maximumf %32, %33 : vector<32x128xf32>
    %cst_25 = arith.constant 0.000000e+00 : f32
    %35 = vector.broadcast %cst_25 : f32 to vector<32x128xf32>
    %cst_26 = arith.constant 0.000000e+00 : f32
    %36 = vector.broadcast %cst_26 : f32 to vector<32x128xf32>
    %c0_27 = arith.constant 0 : index
    %c0_28 = arith.constant 0 : index
    %37 = vector.load %arg14[%c0_27, %c0_28] : memref<256x128xf32, #tpu.memory_space<vmem>>, vector<32x128xf32>
    %38 = arith.subf %37, %34 : vector<32x128xf32>
    %39 = math.exp %38 : vector<32x128xf32>
    %40 = arith.addf %35, %39 : vector<32x128xf32>
    %41 = vector.extract_strided_slice %1 {offsets = [0, 0], sizes = [1, 128], strides = [1, 1]} : vector<8x128xf32> to vector<1x128xf32>
    %42 = vector.broadcast %41 : vector<1x128xf32> to vector<32x128xf32>
    %43 = arith.mulf %42, %39 : vector<32x128xf32>
    %44 = arith.addf %36, %43 : vector<32x128xf32>
    %c32_29 = arith.constant 32 : index
    %c0_30 = arith.constant 0 : index
    %45 = vector.load %arg14[%c32_29, %c0_30] : memref<256x128xf32, #tpu.memory_space<vmem>>, vector<32x128xf32>
    %46 = arith.subf %45, %34 : vector<32x128xf32>
    %47 = math.exp %46 : vector<32x128xf32>
    %48 = arith.addf %40, %47 : vector<32x128xf32>
    %49 = vector.extract_strided_slice %1 {offsets = [1, 0], sizes = [1, 128], strides = [1, 1]} : vector<8x128xf32> to vector<1x128xf32>
    %50 = vector.broadcast %49 : vector<1x128xf32> to vector<32x128xf32>
    %51 = arith.mulf %50, %47 : vector<32x128xf32>
    %52 = arith.addf %44, %51 : vector<32x128xf32>
    %c64_31 = arith.constant 64 : index
    %c0_32 = arith.constant 0 : index
    %53 = vector.load %arg14[%c64_31, %c0_32] : memref<256x128xf32, #tpu.memory_space<vmem>>, vector<32x128xf32>
    %54 = arith.subf %53, %34 : vector<32x128xf32>
    %55 = math.exp %54 : vector<32x128xf32>
    %56 = arith.addf %48, %55 : vector<32x128xf32>
    %57 = vector.extract_strided_slice %1 {offsets = [2, 0], sizes = [1, 128], strides = [1, 1]} : vector<8x128xf32> to vector<1x128xf32>
    %58 = vector.broadcast %57 : vector<1x128xf32> to vector<32x128xf32>
    %59 = arith.mulf %58, %55 : vector<32x128xf32>
    %60 = arith.addf %52, %59 : vector<32x128xf32>
    %c96_33 = arith.constant 96 : index
    %c0_34 = arith.constant 0 : index
    %61 = vector.load %arg14[%c96_33, %c0_34] : memref<256x128xf32, #tpu.memory_space<vmem>>, vector<32x128xf32>
    %62 = arith.subf %61, %34 : vector<32x128xf32>
    %63 = math.exp %62 : vector<32x128xf32>
    %64 = arith.addf %56, %63 : vector<32x128xf32>
    %65 = vector.extract_strided_slice %1 {offsets = [3, 0], sizes = [1, 128], strides = [1, 1]} : vector<8x128xf32> to vector<1x128xf32>
    %66 = vector.broadcast %65 : vector<1x128xf32> to vector<32x128xf32>
    %67 = arith.mulf %66, %63 : vector<32x128xf32>
    %68 = arith.addf %60, %67 : vector<32x128xf32>
    %c128_35 = arith.constant 128 : index
    %c0_36 = arith.constant 0 : index
    %69 = vector.load %arg14[%c128_35, %c0_36] : memref<256x128xf32, #tpu.memory_space<vmem>>, vector<32x128xf32>
    %70 = arith.subf %69, %34 : vector<32x128xf32>
    %71 = math.exp %70 : vector<32x128xf32>
    %72 = arith.addf %64, %71 : vector<32x128xf32>
    %73 = vector.extract_strided_slice %1 {offsets = [4, 0], sizes = [1, 128], strides = [1, 1]} : vector<8x128xf32> to vector<1x128xf32>
    %74 = vector.broadcast %73 : vector<1x128xf32> to vector<32x128xf32>
    %75 = arith.mulf %74, %71 : vector<32x128xf32>
    %76 = arith.addf %68, %75 : vector<32x128xf32>
    %c160_37 = arith.constant 160 : index
    %c0_38 = arith.constant 0 : index
    %77 = vector.load %arg14[%c160_37, %c0_38] : memref<256x128xf32, #tpu.memory_space<vmem>>, vector<32x128xf32>
    %78 = arith.subf %77, %34 : vector<32x128xf32>
    %79 = math.exp %78 : vector<32x128xf32>
    %80 = arith.addf %72, %79 : vector<32x128xf32>
    %81 = vector.extract_strided_slice %1 {offsets = [5, 0], sizes = [1, 128], strides = [1, 1]} : vector<8x128xf32> to vector<1x128xf32>
    %82 = vector.broadcast %81 : vector<1x128xf32> to vector<32x128xf32>
    %83 = arith.mulf %82, %79 : vector<32x128xf32>
    %84 = arith.addf %76, %83 : vector<32x128xf32>
    %c192_39 = arith.constant 192 : index
    %c0_40 = arith.constant 0 : index
    %85 = vector.load %arg14[%c192_39, %c0_40] : memref<256x128xf32, #tpu.memory_space<vmem>>, vector<32x128xf32>
    %86 = arith.subf %85, %34 : vector<32x128xf32>
    %87 = math.exp %86 : vector<32x128xf32>
    %88 = arith.addf %80, %87 : vector<32x128xf32>
    %89 = vector.extract_strided_slice %1 {offsets = [6, 0], sizes = [1, 128], strides = [1, 1]} : vector<8x128xf32> to vector<1x128xf32>
    %90 = vector.broadcast %89 : vector<1x128xf32> to vector<32x128xf32>
    %91 = arith.mulf %90, %87 : vector<32x128xf32>
    %92 = arith.addf %84, %91 : vector<32x128xf32>
    %c224_41 = arith.constant 224 : index
    %c0_42 = arith.constant 0 : index
    %93 = vector.load %arg14[%c224_41, %c0_42] : memref<256x128xf32, #tpu.memory_space<vmem>>, vector<32x128xf32>
    %94 = arith.subf %93, %34 : vector<32x128xf32>
    %95 = math.exp %94 : vector<32x128xf32>
    %96 = arith.addf %88, %95 : vector<32x128xf32>
    %97 = vector.extract_strided_slice %1 {offsets = [7, 0], sizes = [1, 128], strides = [1, 1]} : vector<8x128xf32> to vector<1x128xf32>
    %98 = vector.broadcast %97 : vector<1x128xf32> to vector<32x128xf32>
    %99 = arith.mulf %98, %95 : vector<32x128xf32>
    %100 = arith.addf %92, %99 : vector<32x128xf32>
    %101 = tpu.reciprocal %96 : vector<32x128xf32> -> vector<32x128xf32>
    %102 = arith.mulf %100, %101 : vector<32x128xf32>
    %c0_43 = arith.constant 0 : index
    %c0_44 = arith.constant 0 : index
    %103 = vector.load %arg6[%c0_43, %c0_44] : memref<32x32xf32, #tpu.memory_space<vmem>>, vector<32x32xf32>
    %cst_45 = arith.constant dense<0.000000e+00> : vector<32x128xf32>
    %104 = tpu.matmul %103, %102, %cst_45 {dimension_numbers = #tpu.dot_dimension_numbers<[1], [0], [0], [1], [0, 0, 1, 1], [], []>} : vector<32x32xf32>, vector<32x128xf32>, vector<32x128xf32> -> vector<32x128xf32>
    %c0_46 = arith.constant 0 : index
    %c0_47 = arith.constant 0 : index
    %105 = vector.load %arg7[%c0_46, %c0_47] : memref<32x1xf32, #tpu.memory_space<vmem>>, vector<32x1xf32>
    %106 = vector.broadcast %105 : vector<32x1xf32> to vector<32x128xf32>
    %107 = arith.addf %104, %106 : vector<32x128xf32>
    %cst_48 = arith.constant 0.000000e+00 : f32
    %108 = vector.broadcast %cst_48 : f32 to vector<32x128xf32>
    %109 = arith.maximumf %107, %108 : vector<32x128xf32>
    %c0_49 = arith.constant 0 : index
    %c0_50 = arith.constant 0 : index
    %110 = vector.load %arg8[%c0_49, %c0_50] : memref<32x32xf32, #tpu.memory_space<vmem>>, vector<32x32xf32>
    %cst_51 = arith.constant dense<0.000000e+00> : vector<32x128xf32>
    %111 = tpu.matmul %110, %109, %cst_51 {dimension_numbers = #tpu.dot_dimension_numbers<[1], [0], [0], [1], [0, 0, 1, 1], [], []>} : vector<32x32xf32>, vector<32x128xf32>, vector<32x128xf32> -> vector<32x128xf32>
    %c0_52 = arith.constant 0 : index
    %c0_53 = arith.constant 0 : index
    %112 = vector.load %arg9[%c0_52, %c0_53] : memref<32x1xf32, #tpu.memory_space<vmem>>, vector<32x1xf32>
    %113 = vector.broadcast %112 : vector<32x1xf32> to vector<32x128xf32>
    %114 = arith.addf %111, %113 : vector<32x128xf32>
    %cst_54 = arith.constant 0.000000e+00 : f32
    %115 = vector.broadcast %cst_54 : f32 to vector<32x128xf32>
    %116 = arith.maximumf %114, %115 : vector<32x128xf32>
    %c0_55 = arith.constant 0 : index
    %c0_56 = arith.constant 0 : index
    %117 = vector.load %arg10[%c0_55, %c0_56] : memref<1x32xf32, #tpu.memory_space<vmem>>, vector<1x32xf32>
    %cst_57 = arith.constant dense<0.000000e+00> : vector<1x128xf32>
    %118 = tpu.matmul %117, %116, %cst_57 {dimension_numbers = #tpu.dot_dimension_numbers<[1], [0], [0], [1], [0, 0, 1, 1], [], []>} : vector<1x32xf32>, vector<32x128xf32>, vector<1x128xf32> -> vector<1x128xf32>
    %119 = arith.addf %118, %13 : vector<1x128xf32>
    %c0_58 = arith.constant 0 : index
    %c0_59 = arith.constant 0 : index
    %120 = vector.load %arg12[%c0_58, %c0_59] : memref<1x1xf32, #tpu.memory_space<vmem>>, vector<1x1xf32>
    %121 = vector.broadcast %120 : vector<1x1xf32> to vector<1x128xf32>
    %122 = arith.addf %119, %121 : vector<1x128xf32>
    %c0_60 = arith.constant 0 : index
    %c0_61 = arith.constant 0 : index
    %123 = vector.load %arg13[%c0_60, %c0_61] : memref<1x128xf32, #tpu.memory_space<vmem>>, vector<1x128xf32>
    tpu.vector_store %arg13[%c0_60, %c0_61], %122 {strides = array<i32>} : memref<1x128xf32, #tpu.memory_space<vmem>>, vector<1x128xf32>,
    return
  }
  func.func @transform_0(%arg0: i32) -> (i32, i32) {
    %c0_i32 = arith.constant 0 : i32
    %c0_i32_0 = arith.constant 0 : i32
    return %c0_i32, %arg0 : i32, i32
  }
  func.func @transform_1(%arg0: i32) -> (i32, i32) {
    %c0_i32 = arith.constant 0 : i32
    %c0_i32_0 = arith.constant 0 : i32
    %c0_i32_1 = arith.constant 0 : i32
    return %c0_i32, %c0_i32_0 : i32, i32
  }
  func.func @transform_2(%arg0: i32) -> (i32, i32) {
    %c0_i32 = arith.constant 0 : i32
    %c0_i32_0 = arith.constant 0 : i32
    %c0_i32_1 = arith.constant 0 : i32
    return %c0_i32, %c0_i32_0 : i32, i32
  }
  func.func @transform_3(%arg0: i32) -> (i32, i32) {
    %c0_i32 = arith.constant 0 : i32
    %c0_i32_0 = arith.constant 0 : i32
    %c0_i32_1 = arith.constant 0 : i32
    return %c0_i32, %c0_i32_0 : i32, i32
  }
  func.func @transform_4(%arg0: i32) -> (i32, i32) {
    %c0_i32 = arith.constant 0 : i32
    %c0_i32_0 = arith.constant 0 : i32
    %c0_i32_1 = arith.constant 0 : i32
    return %c0_i32, %c0_i32_0 : i32, i32
  }
  func.func @transform_5(%arg0: i32) -> (i32, i32) {
    %c0_i32 = arith.constant 0 : i32
    %c0_i32_0 = arith.constant 0 : i32
    %c0_i32_1 = arith.constant 0 : i32
    return %c0_i32, %c0_i32_0 : i32, i32
  }
  func.func @transform_6(%arg0: i32) -> (i32, i32) {
    %c0_i32 = arith.constant 0 : i32
    %c0_i32_0 = arith.constant 0 : i32
    %c0_i32_1 = arith.constant 0 : i32
    return %c0_i32, %c0_i32_0 : i32, i32
  }
  func.func @transform_7(%arg0: i32) -> (i32, i32) {
    %c0_i32 = arith.constant 0 : i32
    %c0_i32_0 = arith.constant 0 : i32
    %c0_i32_1 = arith.constant 0 : i32
    return %c0_i32, %c0_i32_0 : i32, i32
  }
  func.func @transform_8(%arg0: i32) -> (i32, i32) {
    %c0_i32 = arith.constant 0 : i32
    %c0_i32_0 = arith.constant 0 : i32
    %c0_i32_1 = arith.constant 0 : i32
    return %c0_i32, %c0_i32_0 : i32, i32
  }
  func.func @transform_9(%arg0: i32) -> (i32, i32) {
    %c0_i32 = arith.constant 0 : i32
    %c0_i32_0 = arith.constant 0 : i32
    %c0_i32_1 = arith.constant 0 : i32
    return %c0_i32, %c0_i32_0 : i32, i32
  }
  func.func @transform_10(%arg0: i32) -> (i32, i32) {
    %c0_i32 = arith.constant 0 : i32
    %c0_i32_0 = arith.constant 0 : i32
    %c0_i32_1 = arith.constant 0 : i32
    return %c0_i32, %c0_i32_0 : i32, i32
  }
  func.func @transform_11(%arg0: i32) -> (i32, i32) {
    %c0_i32 = arith.constant 0 : i32
    %c0_i32_0 = arith.constant 0 : i32
    %c0_i32_1 = arith.constant 0 : i32
    return %c0_i32, %c0_i32_0 : i32, i32
  }
  func.func @transform_12(%arg0: i32) -> (i32, i32) {
    %c0_i32 = arith.constant 0 : i32
    %c0_i32_0 = arith.constant 0 : i32
    return %c0_i32, %arg0 : i32, i32
  }
}

</mosaic_0001>

<bundles_post_ra>
// kernel: tpu_custom_call.1
= control target key start
LH: loop header
LB: loop body
LE: loop exit
PB: predicated region body
PF: predicated region fallthrough
CT: control target
= control target key end

     0   :  { %s2213_s0 = inlined_call_operand.vmem [shape: f32[40,8], index: 0, kind: input, shape index: {}]   ;;  %s2214_s1 = inlined_call_operand.vmem [shape: f32[96,32], index: 1, kind: input, shape index: {}]   ;;  %s2215_s2 = inlined_call_operand.vmem [shape: f32[96,1], index: 2, kind: input, shape index: {}]   ;;  %s2216_s3 = inlined_call_operand.vmem [shape: f32[256,64], index: 3, kind: input, shape index: {}]   ;;  %s2217_s4 = inlined_call_operand.vmem [shape: f32[256,1], index: 4, kind: input, shape index: {}]   ;;  %s2218_s5 = inlined_call_operand.vmem [shape: f32[32,32], index: 5, kind: input, shape index: {}]   ;;  %s2219_s6 = inlined_call_operand.vmem [shape: f32[32,1], index: 6, kind: input, shape index: {}]   ;;  %s2220_s7 = inlined_call_operand.vmem [shape: f32[32,32], index: 7, kind: input, shape index: {}]   ;;  %s2221_s8 = inlined_call_operand.vmem [shape: f32[32,1], index: 8, kind: input, shape index: {}]   ;;  %s2222_s9 = inlined_call_operand.vmem [shape: f32[1,32], index: 9, kind: input, shape index: {}]   ;;  %s2223_s10 = inlined_call_operand.vmem [shape: f32[1,32], index: 10, kind: input, shape index: {}]   ;;  %s2224_s11 = inlined_call_operand.<no memory space> [shape: f32[1,1], index: 11, kind: input, shape index: {}]   ;;  %s2225_s12 = inlined_call_operand.hbm [shape: f32[1,8], index: 12, kind: output, shape index: {}]  }
   0x1   :  { %v17_v0 = vstv %s2224_s11 }
   0x2   :  { %18 = vst [vmem:[#allocation3] sm:$0x1] %v17_v0 }
   0x3   :  { %v48_v1 = vld [vmem:[%s2213_s0 + $0x20] sm:$0xff]  ;;  %v68_v2 = vld [vmem:[%s2215_s2 + $0x38] sm:$0xff]  ;;  %v66_v3 = vld [vmem:[%s2215_s2 + $0x28] sm:$0xff]  ;;  %v1421_v4 = vmov 0   ;;  %vm133_vm0 = vcmask 261120  }
   0x4   :  { %1322 = vset.pattern.permute.xlu2 %v1421_v4  ;;  %1321 = vset.pattern.permute.xlu1 %v1421_v4  ;;  %v64_v5 = vld [vmem:[%s2215_s2 + $0x18] sm:$0xff]  ;;  %v46_v7 = vld [vmem:[%s2213_s0 + $0x10] sm:$0xff]  ;;  %v45_v8 = vld [vmem:[%s2213_s0 + $0x8] sm:$0xff] }
   0x5   :  { %v47_v6 = vld [vmem:[%s2213_s0 + $0x18] sm:$0xff]  ;;  %1320 = vset.pattern.permute.xlu0 %v1421_v4  ;;  %182 = vmatpush.msra.mxu0 %v48_v1  ;;  %v49_v9 = vld [vmem:[%s2214_s1] sm:$0xff]  ;;  %v67_v10 = vld [vmem:[%s2215_s2 + $0x30] sm:$0xff] }
   0x6   :  { %110 = vperm.xlu0 %1320, %v68_v2   ;;  %100 = vperm.xlu1 %1321, %v66_v3   ;;  %v65_v11 = vld [vmem:[%s2215_s2 + $0x20] sm:$0xff] }
   0x7   :  { %90 = vperm.xlu2 %1322, %v64_v5   ;;  %183 = vmatpush.msra.mxu0 %v47_v6 }
   0x9   :  { %184 = vmatpush.msra.mxu0 %v46_v7 }
   0xb   :  { %185 = vmatpush.msra.mxu0 %v45_v8 }
   0xc   :  { %19 = vsyncpa [#allocation5], 0  ;;  %1240 = vmatmul.msk.f32.vlgmr.msra.gmra.mxu0 %vm133_vm0, %v49_v9  ;;  %v63_v12 = vld [vmem:[%s2215_s2 + $0x10] sm:$0xff]  ;;  %v50_v13 = vld [vmem:[%s2214_s1 + $0x8] sm:$0xff]  ;;  %vm483_vm1 = vcmask 523264   ;;  %s1422_s23 = smov [#allocation4]  }
   0xd   :  { %v62_v14 = vld [vmem:[%s2215_s2 + $0x8] sm:$0xff]  ;;  %v61_v15 = vld [vmem:[%s2215_s2] sm:$0xff]  ;;  %v72_v16 = vld [vmem:[%s2215_s2 + $0x58] sm:$0xff]  ;;  %s1229_s24 = sshll.u32 %s1422_s23, 4  ;;  %s1231_s27 = sshll.u32 %s2225_s12, 4  ;;  %s1230_s24 = int_to_ptr.vmem [resolvable:$true] %s1229_s24  ;;  %s1232_s27 = int_to_ptr.hbm [resolvable:$true] %s1231_s27 }
   0xe   :  { %105 = vperm.xlu0 %1320, %v67_v10   ;;  %95 = vperm.xlu1 %1321, %v65_v11   ;;  %v51_v17 = vld [vmem:[%s2214_s1 + $0x10] sm:$0xff]  ;;  %v70_v19 = vld [vmem:[%s2215_s2 + $0x48] sm:$0xff]  ;;  %v69_v20 = vld [vmem:[%s2215_s2 + $0x40] sm:$0xff] }
   0xf   :  { %85 = vperm.xlu2 %1322, %v63_v12   ;;  %v71_v18 = vld [vmem:[%s2215_s2 + $0x50] sm:$0xff]  ;;  %v52_v21 = vld [vmem:[%s2214_s1 + $0x18] sm:$0xff]  ;;  %v53_v25 = vld [vmem:[%s2214_s1 + $0x20] sm:$0xff] }
  0x10   :  { %v294_v22 = vld [vmem:[%s2217_s4 + $0x18] sm:$0xff]  ;;  %v54_v29 = vld [vmem:[%s2214_s1 + $0x28] sm:$0xff]  ;;  %v293_v32 = vld [vmem:[%s2217_s4 + $0x10] sm:$0xff] }
  0x11   :  { %v298_v23 = vld [vmem:[%s2217_s4 + $0x38] sm:$0xff]  ;;  %v55_v33 = vld [vmem:[%s2214_s1 + $0x30] sm:$0xff]  ;;  %v57_v41 = vld [vmem:[%s2214_s1 + $0x40] sm:$0xff] }
  0x12   :  { %v302_v24 = vld [vmem:[%s2217_s4 + $0x58] sm:$0xff]  ;;  %v297_v34 = vld [vmem:[%s2217_s4 + $0x30] sm:$0xff]  ;;  %v292_v43 = vld [vmem:[%s2217_s4 + $0x8] sm:$0xff] }
  0x13   :  { %v306_v26 = vld [vmem:[%s2217_s4 + $0x78] sm:$0xff]  ;;  %v301_v35 = vld [vmem:[%s2217_s4 + $0x50] sm:$0xff]  ;;  %v296_v44 = vld [vmem:[%s2217_s4 + $0x28] sm:$0xff] }
  0x14   :  { %1241 = vmatmul.msk.f32.gmra.mxu0 %vm133_vm0, %v50_v13  ;;  %v310_v27 = vld [vmem:[%s2217_s4 + $0x98] sm:$0xff]  ;;  %v305_v36 = vld [vmem:[%s2217_s4 + $0x70] sm:$0xff]  ;;  %v58_v45 = vld [vmem:[%s2214_s1 + $0x48] sm:$0xff] }
  0x15   :  { %v314_v28 = vld [vmem:[%s2217_s4 + $0xb8] sm:$0xff]  ;;  %v309_v38 = vld [vmem:[%s2217_s4 + $0x90] sm:$0xff]  ;;  %v300_v46 = vld [vmem:[%s2217_s4 + $0x48] sm:$0xff] }
  0x16   :  { %80 = vperm.xlu0 %1320, %v62_v14   ;;  %75 = vperm.xlu1 %1321, %v61_v15   ;;  %v318_v30 = vld [vmem:[%s2217_s4 + $0xd8] sm:$0xff]  ;;  %v313_v39 = vld [vmem:[%s2217_s4 + $0xb0] sm:$0xff]  ;;  %v304_v47 = vld [vmem:[%s2217_s4 + $0x68] sm:$0xff] }
  0x17   :  { %130 = vperm.xlu2 %1322, %v72_v16   ;;  %v322_v31 = vld [vmem:[%s2217_s4 + $0xf8] sm:$0xff]  ;;  %v317_v40 = vld [vmem:[%s2217_s4 + $0xd0] sm:$0xff]  ;;  %v308_v48 = vld [vmem:[%s2217_s4 + $0x88] sm:$0xff] }
  0x18   :  { %v56_v37 = vld [vmem:[%s2214_s1 + $0x38] sm:$0xff]  ;;  %v321_v42 = vld [vmem:[%s2217_s4 + $0xf0] sm:$0xff]  ;;  %v312_v50 = vld [vmem:[%s2217_s4 + $0xa8] sm:$0xff] }
  0x19   :  { %v59_v49 = vld [vmem:[%s2214_s1 + $0x50] sm:$0xff]  ;;  %v316_v51 = vld [vmem:[%s2217_s4 + $0xc8] sm:$0xff]  ;;  %v60_v53 = vld [vmem:[%s2214_s1 + $0x58] sm:$0xff] }
  0x1a   :  { %v320_v52 = vld [vmem:[%s2217_s4 + $0xe8] sm:$0xff]  ;;  %v291_v54 = vld [vmem:[%s2217_s4] sm:$0xff]  ;;  %v1052_v62 = vld [vmem:[%s2219_s6 + $0x18] sm:$0xff] }
  0x1b   :  { %v295_v55 = vld [vmem:[%s2217_s4 + $0x20] sm:$0xff]  ;;  %v1051_v63 = vld [vmem:[%s2219_s6 + $0x10] sm:$0xff]  ;;  %v1050_v0 = vld [vmem:[%s2219_s6 + $0x8] sm:$0xff] }
  0x1c   :  { %1242 = vmatmul.msk.f32.gmra.mxu0 %vm133_vm0, %v51_v17  ;;  %v299_v56 = vld [vmem:[%s2217_s4 + $0x40] sm:$0xff]  ;;  %v1125_v2 = vld [vmem:[%s2221_s8 + $0x18] sm:$0xff]  ;;  %v1124_v3 = vld [vmem:[%s2221_s8 + $0x10] sm:$0xff] }
  0x1d   :  { %v303_v57 = vld [vmem:[%s2217_s4 + $0x60] sm:$0xff]  ;;  %v1123_v4 = vld [vmem:[%s2221_s8 + $0x8] sm:$0xff] }
  0x1e   :  { %125 = vperm.xlu0 %1320, %v71_v18   ;;  %120 = vperm.xlu1 %1321, %v70_v19   ;;  %v307_v58 = vld [vmem:[%s2217_s4 + $0x80] sm:$0xff] }
  0x1f   :  { %115 = vperm.xlu2 %1322, %v69_v20   ;;  %v311_v59 = vld [vmem:[%s2217_s4 + $0xa0] sm:$0xff] }
  0x20   :  { %v315_v60 = vld [vmem:[%s2217_s4 + $0xc0] sm:$0xff] }
  0x21   :  { %v319_v61 = vld [vmem:[%s2217_s4 + $0xe0] sm:$0xff] }
  0x22   :  { %v1049_v1 = vld [vmem:[%s2219_s6] sm:$0xff] }
  0x23   :  { %v1122_v6 = vld [vmem:[%s2221_s8] sm:$0xff] }
  0x24   :  { %1243 = vmatmul.msk.f32.gmra.mxu0 %vm133_vm0, %v52_v21  ;;  %v1215_v7 = vld [vmem:[#allocation3] sm:$0x1] }
  0x26   :  { %340 = vperm.xlu0 %1320, %v294_v22   ;;  %360 = vperm.xlu1 %1321, %v298_v23  }
  0x27   :  { %380 = vperm.xlu2 %1322, %v302_v24  }
  0x2c   :  { %1244 = vmatmul.msk.f32.gmra.mxu0 %vm133_vm0, %v53_v25 }
  0x2e   :  { %400 = vperm.xlu0 %1320, %v306_v26   ;;  %420 = vperm.xlu1 %1321, %v310_v27  }
  0x2f   :  { %440 = vperm.xlu2 %1322, %v314_v28  }
  0x34   :  { %1245 = vmatmul.msk.f32.gmra.mxu0 %vm133_vm0, %v54_v29 }
  0x36   :  { %460 = vperm.xlu0 %1320, %v318_v30   ;;  %480 = vperm.xlu1 %1321, %v322_v31  }
  0x37   :  { %335 = vperm.xlu2 %1322, %v293_v32  }
  0x3c   :  { %1246 = vmatmul.msk.f32.gmra.mxu0 %vm133_vm0, %v55_v33 }
  0x3e   :  { %355 = vperm.xlu0 %1320, %v297_v34   ;;  %375 = vperm.xlu1 %1321, %v301_v35  }
  0x3f   :  { %395 = vperm.xlu2 %1322, %v305_v36  }
  0x44   :  { %1247 = vmatmul.msk.f32.gmra.mxu0 %vm133_vm0, %v56_v37 }
  0x46   :  { %415 = vperm.xlu0 %1320, %v309_v38   ;;  %435 = vperm.xlu1 %1321, %v313_v39  }
  0x47   :  { %455 = vperm.xlu2 %1322, %v317_v40  }
  0x4c   :  { %1248 = vmatmul.msk.f32.gmra.mxu0 %vm133_vm0, %v57_v41  ;;  %v259_v41 = vld [vmem:[%s2216_s3] sm:$0xff] }
  0x4e   :  { %475 = vperm.xlu0 %1320, %v321_v42   ;;  %330 = vperm.xlu1 %1321, %v292_v43   ;;  %v269_v42 = vld [vmem:[%s2216_s3 + $0x50] sm:$0xff]  ;;  %v282_v43 = vld [vmem:[%s2216_s3 + $0xb8] sm:$0xff] }
  0x4f   :  { %350 = vperm.xlu2 %1322, %v296_v44  }
  0x54   :  { %1249 = vmatmul.msk.f32.gmra.mxu0 %vm133_vm0, %v58_v45  ;;  %v270_v45 = vld [vmem:[%s2216_s3 + $0x58] sm:$0xff] }
  0x56   :  { %370 = vperm.xlu0 %1320, %v300_v46   ;;  %390 = vperm.xlu1 %1321, %v304_v47   ;;  %v283_v46 = vld [vmem:[%s2216_s3 + $0xc0] sm:$0xff] }
  0x57   :  { %410 = vperm.xlu2 %1322, %v308_v48  }
  0x5c   :  { %1250 = vmatmul.msk.f32.gmra.mxu0 %vm133_vm0, %v59_v49 }
  0x5e   :  { %430 = vperm.xlu0 %1320, %v312_v50   ;;  %450 = vperm.xlu1 %1321, %v316_v51  }
  0x5f   :  { %470 = vperm.xlu2 %1322, %v320_v52   ;;  %v271_v52 = vld [vmem:[%s2216_s3 + $0x60] sm:$0xff] }
  0x61   :  { %v91_v16 = vpop.permute.xlu2 %90 }
  0x64   :  { %1251 = vmatmul.msk.f32.gmra.mxu0 %vm133_vm0, %v60_v53  ;;  %v284_v53 = vld [vmem:[%s2216_s3 + $0xc8] sm:$0xff] }
  0x66   :  { %325 = vperm.xlu0 %1320, %v291_v54   ;;  %345 = vperm.xlu1 %1321, %v295_v55  }
  0x67   :  { %365 = vperm.xlu2 %1322, %v299_v56  }
  0x69   :  { %v86_v28 = vpop.permute.xlu2 %85 }
  0x6e   :  { %385 = vperm.xlu0 %1320, %v303_v57   ;;  %405 = vperm.xlu1 %1321, %v307_v58  }
  0x6f   :  { %425 = vperm.xlu2 %1322, %v311_v59  }
  0x71   :  { %v131_v47 = vpop.permute.xlu2 %130 }
  0x76   :  { %445 = vperm.xlu0 %1320, %v315_v60   ;;  %465 = vperm.xlu1 %1321, %v319_v61  }
  0x77   :  { %1070 = vperm.xlu2 %1322, %v1052_v62   ;;  %v272_v62 = vld [vmem:[%s2216_s3 + $0x68] sm:$0xff] }
  0x78   :  { %v111_v13 = vpop.permute.xlu0 %110  ;;  %v101_v14 = vpop.permute.xlu1 %100 }
  0x79   :  { %v116_v57 = vpop.permute.xlu2 %115 }
  0x7e   :  { %1065 = vperm.xlu0 %1320, %v1051_v63   ;;  %1060 = vperm.xlu1 %1321, %v1050_v0   ;;  %v285_v63 = vld [vmem:[%s2216_s3 + $0xd0] sm:$0xff]  ;;  %v235_v0 = vld [vmem:[%s2223_s10] sm:$0x1] }
  0x7f   :  { %1055 = vperm.xlu2 %1322, %v1049_v1   ;;  %v273_v1 = vld [vmem:[%s2216_s3 + $0x70] sm:$0xff] }
  0x80   :  { %v106_v17 = vpop.permute.xlu0 %105  ;;  %v96_v18 = vpop.permute.xlu1 %95 }
  0x86   :  { %1143 = vperm.xlu0 %1320, %v1125_v2   ;;  %1138 = vperm.xlu1 %1321, %v1124_v3   ;;  %v286_v2 = vld [vmem:[%s2216_s3 + $0xd8] sm:$0xff]  ;;  %v260_v3 = vld [vmem:[%s2216_s3 + $0x8] sm:$0xff] }
  0x87   :  { %1133 = vperm.xlu2 %1322, %v1123_v4   ;;  %v274_v4 = vld [vmem:[%s2216_s3 + $0x78] sm:$0xff] }
  0x88   :  { %v81_v32 = vpop.permute.xlu0 %80  ;;  %v76_v33 = vpop.permute.xlu1 %75 }
  0x89   :  { %v187_v5 = vpop.f32.mrf.mxu0 }
  0x8a   :  { %v188_v36 = vadd.f32 %v187_v5, %v76_v33  ;;  %v287_v5 = vld [vmem:[%s2216_s3 + $0xe0] sm:$0xff] }
  0x8c   :  { %v223_v40 = vmax.f32 %v188_v36, 0.0 }
  0x8e   :  { %1128 = vperm.xlu0 %1320, %v1122_v6   ;;  %1218 = vperm.xlu1 %1321, %v1215_v7   ;;  %v261_v6 = vld [vmem:[%s2216_s3 + $0x10] sm:$0xff]  ;;  %v275_v7 = vld [vmem:[%s2216_s3 + $0x80] sm:$0xff] }
  0x90   :  { %v126_v49 = vpop.permute.xlu0 %125  ;;  %v121_v54 = vpop.permute.xlu1 %120 }
  0x91   :  { %v190_v8 = vpop.f32.mrf.mxu0 }
  0x92   :  { %v191_v34 = vadd.f32 %v190_v8, %v81_v32  ;;  %v288_v8 = vld [vmem:[%s2216_s3 + $0xe8] sm:$0xff] }
  0x94   :  { %v224_v38 = vmax.f32 %v191_v34, 0.0 }
  0x99   :  { %v193_v9 = vpop.f32.mrf.mxu0 }
  0x9a   :  { %v194_v30 = vadd.f32 %v193_v9, %v86_v28  ;;  %v262_v9 = vld [vmem:[%s2216_s3 + $0x18] sm:$0xff] }
  0x9c   :  { %v1729_v37 = vmax.f32 %v194_v30, 0.0 }
  0xa1   :  { %v196_v10 = vpop.f32.mrf.mxu0 }
  0xa2   :  { %v197_v26 = vadd.f32 %v196_v10, %v91_v16  ;;  %v276_v10 = vld [vmem:[%s2216_s3 + $0x88] sm:$0xff]  ;;  %v278_v16 = vld [vmem:[%s2216_s3 + $0x98] sm:$0xff] }
  0xa4   :  { %v1724_v35 = vmax.f32 %v197_v26, 0.0 }
  0xa9   :  { %v199_v11 = vpop.f32.mrf.mxu0 }
  0xaa   :  { %v200_v24 = vadd.f32 %v199_v11, %v96_v18  ;;  %v289_v11 = vld [vmem:[%s2216_s3 + $0xf0] sm:$0xff]  ;;  %v279_v18 = vld [vmem:[%s2216_s3 + $0xa0] sm:$0xff] }
  0xac   :  { %v1719_v31 = vmax.f32 %v200_v24, 0.0  ;;  %v1875_v24 = vpop.permute.xlu1 %360 }
  0xb1   :  { %v202_v12 = vpop.f32.mrf.mxu0 }
  0xb2   :  { %v203_v22 = vadd.f32 %v202_v12, %v101_v14  ;;  %v263_v12 = vld [vmem:[%s2216_s3 + $0x20] sm:$0xff]  ;;  %v290_v14 = vld [vmem:[%s2216_s3 + $0xf8] sm:$0xff] }
  0xb4   :  { %v1714_v27 = vmax.f32 %v203_v22, 0.0  ;;  %v281_v22 = vld [vmem:[%s2216_s3 + $0xb0] sm:$0xff]  ;;  %v421_v26 = vpop.permute.xlu1 %420 }
  0xb9   :  { %v205_v15 = vpop.f32.mrf.mxu0 }
  0xba   :  { %v206_v20 = vadd.f32 %v205_v15, %v106_v17  ;;  %v264_v15 = vld [vmem:[%s2216_s3 + $0x28] sm:$0xff]  ;;  %v265_v17 = vld [vmem:[%s2216_s3 + $0x30] sm:$0xff] }
  0xbc   :  { %v1709_v25 = vmax.f32 %v206_v20, 0.0  ;;  %v280_v20 = vld [vmem:[%s2216_s3 + $0xa8] sm:$0xff] }
  0xc1   :  { %v208_v19 = vpop.f32.mrf.mxu0 }
  0xc2   :  { %v209_v21 = vadd.f32 %v208_v19, %v111_v13  ;;  %v277_v13 = vld [vmem:[%s2216_s3 + $0x90] sm:$0xff]  ;;  %v266_v19 = vld [vmem:[%s2216_s3 + $0x38] sm:$0xff] }
  0xc4   :  { %v1707_v23 = vmax.f32 %v209_v21, 0.0  ;;  %v267_v21 = vld [vmem:[%s2216_s3 + $0x40] sm:$0xff] }
  0xc6   :  { %588 = vmatpush.msrb.mxu0 %v1707_v23  ;;  %1295 = vmatpush.msra.mxu2 %v1707_v23 }
  0xc7   :  { %1296 = vmatpush.msra.mxu3 %v1707_v23 }
  0xc8   :  { %589 = vmatpush.msrb.mxu0 %v1709_v25  ;;  %1298 = vmatpush.msra.mxu2 %v1709_v25 }
  0xc9   :  { %1299 = vmatpush.msra.mxu3 %v1709_v25  ;;  %v211_v29 = vpop.f32.mrf.mxu0 }
  0xca   :  { %590 = vmatpush.msrb.mxu0 %v1714_v27  ;;  %1301 = vmatpush.msra.mxu2 %v1714_v27  ;;  %v212_v58 = vadd.f32 %v211_v29, %v116_v57  ;;  %v481_v29 = vpop.permute.xlu1 %480 }
  0xcb   :  { %1302 = vmatpush.msra.mxu3 %v1714_v27 }
  0xcc   :  { %591 = vmatpush.msrb.mxu0 %v1719_v31  ;;  %1304 = vmatpush.msra.mxu2 %v1719_v31  ;;  %v231_v61 = vmax.f32 %v212_v58, 0.0 }
  0xcd   :  { %1305 = vmatpush.msra.mxu3 %v1719_v31 }
  0xce   :  { %592 = vmatpush.msrb.mxu0 %v1724_v35  ;;  %1307 = vmatpush.msra.mxu2 %v1724_v35 }
  0xcf   :  { %1308 = vmatpush.msra.mxu3 %v1724_v35 }
  0xd0   :  { %593 = vmatpush.msrb.mxu0 %v1729_v37  ;;  %1310 = vmatpush.msra.mxu2 %v1729_v37 }
  0xd1   :  { %1311 = vmatpush.msra.mxu3 %v1729_v37  ;;  %v214_v39 = vpop.f32.mrf.mxu0 }
  0xd2   :  { %594 = vmatpush.msrb.mxu0 %v224_v38  ;;  %1313 = vmatpush.msra.mxu2 %v224_v38  ;;  %v215_v56 = vadd.f32 %v214_v39, %v121_v54  ;;  %v376_v34 = vpop.permute.xlu1 %375 }
  0xd3   :  { %1314 = vmatpush.msra.mxu3 %v224_v38 }
  0xd4   :  { %595 = vmatpush.msrb.mxu0 %v223_v40  ;;  %1316 = vmatpush.msra.mxu2 %v223_v40  ;;  %v232_v60 = vmax.f32 %v215_v56, 0.0 }
  0xd5   :  { %1317 = vmatpush.msra.mxu3 %v223_v40  ;;  %1253 = vmatmul.msk.f32.vlgmr.msrb.gmra.mxu0 %vm483_vm1, %v259_v41 }
  0xd6   :  { %1263 = vmatmul.msk.f32.vlgmr.msra.gmra.mxu2 %vm483_vm1, %v269_v42  ;;  %1276 = vmatmul.msk.f32.vlgmr.msra.gmra.mxu3 %vm483_vm1, %v282_v43 }
  0xd9   :  { %v217_v44 = vpop.f32.mrf.mxu0 }
  0xda   :  { %v218_v51 = vadd.f32 %v217_v44, %v126_v49  ;;  %v1891_v41 = vpop.permute.xlu1 %435 }
  0xdc   :  { %v233_v59 = vmax.f32 %v218_v51, 0.0 }
  0xde   :  { %1264 = vmatmul.msk.f32.gmra.mxu2 %vm483_vm1, %v270_v45  ;;  %1277 = vmatmul.msk.f32.gmra.mxu3 %vm483_vm1, %v283_v46 }
  0xe1   :  { %v220_v48 = vpop.f32.mrf.mxu0 }
  0xe2   :  { %v221_v50 = vadd.f32 %v220_v48, %v131_v47  ;;  %v1901_v47 = vpop.permute.xlu1 %330 }
  0xe4   :  { %v234_v55 = vmax.f32 %v221_v50, 0.0 }
  0xe6   :  { %1265 = vmatmul.msk.f32.gmra.mxu2 %vm483_vm1, %v271_v52  ;;  %1278 = vmatmul.msk.f32.gmra.mxu3 %vm483_vm1, %v284_v53 }
  0xe7   :  { %251 = vmatpush.msra.mxu1 %v234_v55 }
  0xe9   :  { %252 = vmatpush.msra.mxu1 %v233_v59 }
  0xea   :  { %v391_v56 = vpop.permute.xlu1 %390 }
  0xeb   :  { %253 = vmatpush.msra.mxu1 %v232_v60 }
  0xed   :  { %254 = vmatpush.msra.mxu1 %v231_v61 }
  0xee   :  { %1266 = vmatmul.msk.f32.gmra.mxu2 %vm483_vm1, %v272_v62  ;;  %1279 = vmatmul.msk.f32.gmra.mxu3 %vm483_vm1, %v285_v63 }
  0xef   :  { %1294 = vmatpush.msrb.mxu1 %v1707_v23  ;;  %v268_v23 = vld [vmem:[%s2216_s3 + $0x48] sm:$0xff] }
  0xf0   :  { %1252 = vmatmul.msk.f32.vlgmr.msra.gmra.mxu1 %vm133_vm0, %v235_v0 }
  0xf1   :  { %1297 = vmatpush.msrb.mxu1 %v1709_v25  ;;  %v1877_v25 = vpop.permute.xlu0 %340 }
  0xf2   :  { %v451_v62 = vpop.permute.xlu1 %450 }
  0xf3   :  { %1300 = vmatpush.msrb.mxu1 %v1714_v27  ;;  %v1879_v27 = vpop.permute.xlu2 %380 }
  0xf5   :  { %1303 = vmatpush.msrb.mxu1 %v1719_v31 }
  0xf6   :  { %1267 = vmatmul.msk.f32.gmra.mxu2 %vm483_vm1, %v273_v1  ;;  %1280 = vmatmul.msk.f32.gmra.mxu3 %vm483_vm1, %v286_v2 }
  0xf7   :  { %1306 = vmatpush.msrb.mxu1 %v1724_v35 }
  0xf9   :  { %1309 = vmatpush.msrb.mxu1 %v1729_v37  ;;  %v401_v28 = vpop.permute.xlu0 %400 }
  0xfb   :  { %1312 = vmatpush.msrb.mxu1 %v224_v38  ;;  %v441_v30 = vpop.permute.xlu2 %440 }
  0xfd   :  { %1315 = vmatpush.msrb.mxu1 %v223_v40 }
  0xfe   :  { %1254 = vmatmul.msk.f32.vlgmr.msrb.gmra.mxu1 %vm483_vm1, %v260_v3  ;;  %1268 = vmatmul.msk.f32.gmra.mxu2 %vm483_vm1, %v274_v4 }
  0xff   :  { %1281 = vmatmul.msk.f32.gmra.mxu3 %vm483_vm1, %v287_v5 }
 0x101   :  { %v1881_v31 = vpop.permute.xlu0 %460 }
 0x103   :  { %v1883_v37 = vpop.permute.xlu2 %335 }
 0x106   :  { %1255 = vmatmul.msk.f32.gmra.mxu1 %vm483_vm1, %v261_v6  ;;  %1269 = vmatmul.msk.f32.gmra.mxu2 %vm483_vm1, %v275_v7  ;;  %v346_v6 = vpop.permute.xlu1 %345 }
 0x107   :  { %1282 = vmatmul.msk.f32.gmra.mxu3 %vm483_vm1, %v288_v8 }
 0x109   :  { %v1885_v38 = vpop.permute.xlu0 %355 }
 0x10b   :  { %v396_v42 = vpop.permute.xlu2 %395 }
 0x10e   :  { %1256 = vmatmul.msk.f32.gmra.mxu1 %vm483_vm1, %v262_v9  ;;  %1270 = vmatmul.msk.f32.gmra.mxu2 %vm483_vm1, %v276_v10 }
 0x10f   :  { %1283 = vmatmul.msk.f32.gmra.mxu3 %vm483_vm1, %v289_v11 }
 0x111   :  { %v1893_v43 = vpop.permute.xlu0 %415 }
 0x113   :  { %v1903_v48 = vpop.permute.xlu2 %455 }
 0x116   :  { %1257 = vmatmul.msk.f32.gmra.mxu1 %vm483_vm1, %v263_v12  ;;  %1271 = vmatmul.msk.f32.gmra.mxu2 %vm483_vm1, %v277_v13  ;;  %v406_v12 = vpop.permute.xlu1 %405 }
 0x117   :  { %1284 = vmatmul.msk.f32.gmra.mxu3 %vm483_vm1, %v290_v14 }
 0x119   :  { %v476_v49 = vpop.permute.xlu0 %475 }
 0x11b   :  { %v1913_v57 = vpop.permute.xlu2 %350 }
 0x11e   :  { %1258 = vmatmul.msk.f32.gmra.mxu1 %vm483_vm1, %v264_v15  ;;  %1272 = vmatmul.msk.f32.gmra.mxu2 %vm483_vm1, %v278_v16 }
 0x121   :  { %v1915_v58 = vpop.permute.xlu0 %370 }
 0x122   :  { %2227 = vst [vmem:[#allocation8_spill] sm:$0xff] %v1915_v58 }
 0x123   :  { %v411_v0 = vpop.permute.xlu2 %410 }
 0x126   :  { %1259 = vmatmul.msk.f32.gmra.mxu1 %vm483_vm1, %v265_v17  ;;  %1273 = vmatmul.msk.f32.gmra.mxu2 %vm483_vm1, %v279_v18  ;;  %v466_v18 = vpop.permute.xlu1 %465 }
 0x129   :  { %v1917_v2 = vpop.permute.xlu0 %430 }
 0x12b   :  { %v471_v7 = vpop.permute.xlu2 %470 }
 0x12e   :  { %1260 = vmatmul.msk.f32.gmra.mxu1 %vm483_vm1, %v266_v19  ;;  %1274 = vmatmul.msk.f32.gmra.mxu2 %vm483_vm1, %v280_v20 }
 0x131   :  { %v326_v8 = vpop.permute.xlu0 %325 }
 0x133   :  { %v366_v13 = vpop.permute.xlu2 %365 }
 0x136   :  { %1261 = vmatmul.msk.f32.gmra.mxu1 %vm483_vm1, %v267_v21  ;;  %1275 = vmatmul.msk.f32.gmra.mxu2 %vm483_vm1, %v281_v22 }
 0x139   :  { %v386_v14 = vpop.permute.xlu0 %385 }
 0x13b   :  { %v426_v20 = vpop.permute.xlu2 %425 }
 0x13e   :  { %1262 = vmatmul.msk.f32.gmra.mxu1 %vm483_vm1, %v268_v23 }
 0x141   :  { %v446_v23 = vpop.permute.xlu0 %445 }
 0x159   :  { %v627_v32 = vpop.f32.mrf.mxu2  ;;  %v666_v33 = vpop.f32.mrf.mxu3 }
 0x15a   :  { %v1905_v51 = vadd.f32 %v627_v32, %v376_v34  ;;  %v1923_v32 = vadd.f32 %v666_v33, %v441_v30 }
 0x161   :  { %v630_v35 = vpop.f32.mrf.mxu2  ;;  %v669_v36 = vpop.f32.mrf.mxu3 }
 0x162   :  { %v1928_v54 = vadd.f32 %v669_v36, %v446_v23 }
 0x169   :  { %v1887_v39 = vpop.f32.mrf.mxu2  ;;  %v1889_v40 = vpop.f32.mrf.mxu3 }
 0x16d   :  { %v1895_v44 = vpop.f32.mrf.mxu1 }
 0x16e   :  { %2226 = vst [vmem:[#allocation7_spill] sm:$0xff] %v1895_v44 }
 0x171   :  { %v1897_v45 = vpop.f32.mrf.mxu2  ;;  %v1899_v46 = vpop.f32.mrf.mxu3 }
 0x179   :  { %v639_v50 = vpop.f32.mrf.mxu2  ;;  %v678_v55 = vpop.f32.mrf.mxu3 }
 0x17a   :  { %v1907_v52 = vadd.f32 %v639_v50, %v396_v42  ;;  %v631_v50 = vadd.f32 %v630_v35, %v1879_v27 }
 0x17b   :  { %v1909_v53 = vpop.f32.mrf.mxu1 }
 0x181   :  { %v642_v59 = vpop.f32.mrf.mxu2 }
 0x182   :  { %v681_v61 = vpop.f32.mrf.mxu3  ;;  %v643_v21 = vadd.f32 %v642_v59, %v401_v28  ;;  %v1935_v28 = vadd.f32 %v678_v55, %v1881_v31 }
 0x183   :  { %v603_v60 = vpop.f32.mrf.mxu1  ;;  %v1921_v22 = vadd.f32 %v681_v61, %v466_v18 }
 0x184   :  { %v764_v33 = vmax.f32 %v631_v50, %v643_v21 }
 0x185   :  { %v769_v27 = vmax.f32 %v1928_v54, %v1921_v22 }
 0x189   :  { %v645_v63 = vpop.f32.mrf.mxu2 }
 0x18a   :  { %v684_v4 = vpop.f32.mrf.mxu3  ;;  %v1930_v44 = vadd.f32 %v645_v63, %v406_v12 }
 0x18b   :  { %v606_v1 = vpop.f32.mrf.mxu1  ;;  %v1943_v35 = vadd.f32 %v684_v4, %v471_v7  ;;  %v1962_v7 = vadd.f32 %v1897_v45, %v391_v56 }
 0x18c   :  { %v607_v59 = vadd.f32 %v606_v1, %v1877_v25  ;;  %v1959_v1 = vadd.f32 %v1889_v40, %v451_v62  ;;  %v1978_v40 = vadd.f32 %v603_v60, %v1883_v37 }
 0x18e   :  { %v770_v45 = vmax.f32 %v1959_v1, %v1943_v35 }
 0x191   :  { %v648_v3 = vpop.f32.mrf.mxu2 }
 0x192   :  { %v687_v11 = vpop.f32.mrf.mxu3 }
 0x193   :  { %v609_v5 = vpop.f32.mrf.mxu1  ;;  %v1947_v61 = vadd.f32 %v687_v11, %v476_v49  ;;  %v1966_v49 = vadd.f32 %v1899_v46, %v1903_v48  ;;  %v1985_v48 = vadd.f32 %v648_v3, %v411_v0 }
 0x194   :  { %v1949_v31 = vadd.f32 %v609_v5, %v346_v6  ;;  %v1971_v6 = vld [vmem:[%s2213_s0] sm:$0xff] }
 0x195   :  { %v771_v56 = vmax.f32 %v1966_v49, %v1947_v61  ;;  %v1998_v60 = vperm.slane %v1971_v6, 0 }
 0x199   :  { %v651_v9 = vpop.f32.mrf.mxu2 }
 0x19a   :  { %v690_v17 = vpop.f32.mrf.mxu3 }
 0x19b   :  { %v612_v10 = vpop.f32.mrf.mxu1  ;;  %v1925_v34 = vadd.f32 %v690_v17, %v481_v29 }
 0x19c   :  { %v1995_v37 = vadd.f32 %v612_v10, %v1913_v57 }
 0x19d   :  { %v772_v25 = vmax.f32 %v1935_v28, %v1925_v34 }
 0x1a1   :  { %v654_v15 = vpop.f32.mrf.mxu2 }
 0x1a2   :  { %v1919_v19 = vadd.f32 %v654_v15, %v421_v26  ;;  %v597_v15 = vpop.f32.mrf.mxu0 }
 0x1a3   :  { %v615_v16 = vpop.f32.mrf.mxu1  ;;  %v1953_v63 = vadd.f32 %v597_v15, %v326_v8 }
 0x1a4   :  { %v768_v29 = vmax.f32 %v1919_v19, %v1923_v32  ;;  %v1983_v46 = vadd.f32 %v615_v16, %v1885_v38 }
 0x1a5   :  { %v757_v62 = vmax.f32 %v1953_v63, %v1949_v31 }
 0x1a6   :  { %v780_v5 = vmax.f32 %v768_v29, %v772_v25  ;;  %v759_v17 = vmax.f32 %v1978_v40, %v1983_v46  ;;  %v2021_v29 = vperm.slane %v1971_v6, 2 }
 0x1a9   :  { %v657_v42 = vpop.f32.mrf.mxu2 }
 0x1aa   :  { %v1932_v58 = vadd.f32 %v657_v42, %v426_v20  ;;  %v2012_v42 = vperm.slane %v1971_v6, 1 }
 0x1ab   :  { %v618_v26 = vpop.f32.mrf.mxu1 }
 0x1ac   :  { %v619_v30 = vadd.f32 %v618_v26, %v1875_v24  ;;  %v765_v36 = vmax.f32 %v1930_v44, %v1932_v58  ;;  %v1956_v24 = vadd.f32 %v1887_v39, %v386_v14  ;;  %v1975_v39 = vadd.f32 %v1909_v53, %v1901_v47 }
 0x1ad   :  { %v1992_v53 = vadd.f32 %v651_v9, %v1893_v43  ;;  %v2228_v26 = vmax.f32 %v1905_v51, %v1907_v52 }
 0x1ae   :  { %v760_v55 = vmax.f32 %v607_v59, %v619_v30  ;;  %v777_v4 = vmax.f32 %v765_v36, %v769_v27  ;;  %v758_v23 = vmax.f32 %v1975_v39, %v1995_v37  ;;  %v2024_v27 = vperm.slane %v1971_v6, 3 }
 0x1af   :  { %v775_v15 = vmax.f32 %v759_v17, %v2228_v26  ;;  %v2027_v36 = vperm.slane %v1971_v6, 4 }
 0x1b0   :  { %v776_v8 = vmax.f32 %v760_v55, %v764_v33 }
 0x1b1   :  { %v660_v47 = vpop.f32.mrf.mxu2 }
 0x1b2   :  { %v784_v11 = vmax.f32 %v776_v8, %v780_v5  ;;  %v2001_v38 = vadd.f32 %v660_v47, %v1917_v2  ;;  %v2229_v5 = vld [vmem:[#allocation8_spill] sm:$0xff] }
 0x1b3   :  { %v621_v0 = vpop.f32.mrf.mxu1 }
 0x1b4   :  { %v788_v3 = vsub.f32 %v607_v59, %v784_v11  ;;  %v813_v12 = vsub.f32 %v619_v30, %v784_v11  ;;  %v838_v14 = vsub.f32 %v631_v50, %v784_v11  ;;  %v863_v16 = vsub.f32 %v643_v21, %v784_v11 }
 0x1b5   :  { %v888_v43 = vsub.f32 %v1919_v19, %v784_v11  ;;  %v622_v9 = vadd.f32 %v621_v0, %v366_v13  ;;  %v913_v57 = vsub.f32 %v1923_v32, %v784_v11  ;;  %v766_v2 = vmax.f32 %v1985_v48, %v2001_v38 }
 0x1b6   :  { %v795_v10 = vmul.f32 1.442695, %v788_v3  ;;  %v820_v18 = vmul.f32 1.442695, %v813_v12  ;;  %v845_v20 = vmul.f32 1.442695, %v838_v14  ;;  %v938_v13 = vsub.f32 %v1935_v28, %v784_v11 }
 0x1b7   :  { %v870_v21 = vmul.f32 1.442695, %v863_v16  ;;  %v761_v50 = vmax.f32 %v622_v9, %v1956_v24  ;;  %v895_v19 = vmul.f32 1.442695, %v888_v43  ;;  %v963_v32 = vsub.f32 %v1925_v34, %v784_v11 }
 0x1b8   :  { %1323 = vpow2.f32 %v795_v10  ;;  %v778_v30 = vmax.f32 %v766_v2, %v770_v45  ;;  %v2034_v55 = vmul.f32 1.442695, %v913_v57  ;;  %v2039_v45 = vmul.f32 1.442695, %v938_v13 }
 0x1b9   :  { %1325 = vpow2.f32 %v820_v18  ;;  %v773_v59 = vmax.f32 %v757_v62, %v761_v50  ;;  %v663_v33 = vpop.f32.mrf.mxu2  ;;  %v2041_v62 = vmul.f32 1.442695, %v963_v32  ;;  %v2061_v18 = vperm.slane %v1971_v6, 5 }
 0x1ba   :  { %1327 = vpow2.f32 %v845_v20  ;;  %v2032_v28 = vadd.f32 %v663_v33, %v1891_v41  ;;  %v2070_v33 = vperm.slane %v1971_v6, 6 }
 0x1bb   :  { %1329 = vpow2.f32 %v870_v21  ;;  %v2029_v34 = vmax.f32 %v773_v59, %v777_v4  ;;  %v624_v25 = vpop.f32.mrf.mxu1 }
 0x1bc   :  { %1331 = vpow2.f32 %v895_v19  ;;  %v2037_v8 = vadd.f32 %v624_v25, %v2229_v5  ;;  %v767_v14 = vmax.f32 %v1992_v53, %v2032_v28 }
 0x1bd   :  { %v785_v11 = vsub.f32 %v1953_v63, %v2029_v34  ;;  %v810_v4 = vsub.f32 %v1949_v31, %v2029_v34  ;;  %v835_v41 = vsub.f32 %v622_v9, %v2029_v34  ;;  %v860_v47 = vsub.f32 %v1956_v24, %v2029_v34 }
 0x1be   :  { %v1324_v0 = vpop.eup %1323  ;;  %v885_v3 = vsub.f32 %v1930_v44, %v2029_v34  ;;  %v910_v12 = vsub.f32 %v1932_v58, %v2029_v34  ;;  %v762_v63 = vmax.f32 %v2037_v8, %v1962_v7  ;;  %v779_v2 = vmax.f32 %v767_v14, %v771_v56 }
 0x1bf   :  { %v1326_v16 = vpop.eup %1325  ;;  %v805_v31 = vmul.f32 %v1324_v0, %v1998_v60  ;;  %v789_v17 = vmul.f32 1.442695, %v785_v11  ;;  %v814_v43 = vmul.f32 1.442695, %v810_v4  ;;  %v839_v9 = vmul.f32 1.442695, %v835_v41 }
 0x1c0   :  { %v1328_v24 = vpop.eup %1327  ;;  %v825_v57 = vadd.f32 %v1326_v16, %v1324_v0  ;;  %v830_v10 = vmul.f32 %v1326_v16, %v2012_v42  ;;  %v864_v44 = vmul.f32 1.442695, %v860_v47  ;;  %v889_v20 = vmul.f32 1.442695, %v885_v3 }
 0x1c1   :  { %v1330_v58 = vpop.eup %1329  ;;  %1333 = vpow2.f32 %v789_v17  ;;  %v774_v21 = vmax.f32 %v758_v23, %v762_v63  ;;  %v855_v32 = vmul.f32 %v1328_v24, %v2021_v29  ;;  %v914_v26 = vmul.f32 1.442695, %v910_v12 }
 0x1c2   :  { %v1332_v50 = vpop.eup %1331  ;;  %v834_v19 = vadd.f32 %v830_v10, %v805_v31  ;;  %v850_v13 = vadd.f32 %v1328_v24, %v825_v57  ;;  %1335 = vpow2.f32 %v814_v43  ;;  %v2067_v59 = vmax.f32 %v775_v15, %v779_v2 }
 0x1c3   :  { %1337 = vpow2.f32 %v839_v9  ;;  %v2072_v5 = vmax.f32 %v774_v21, %v778_v30  ;;  %v880_v56 = vmul.f32 %v1330_v58, %v2024_v27 }
 0x1c4   :  { %v875_v25 = vadd.f32 %v1330_v58, %v850_v13  ;;  %v859_v11 = vadd.f32 %v855_v32, %v834_v19  ;;  %1339 = vpow2.f32 %v864_v44  ;;  %v787_v23 = vsub.f32 %v1978_v40, %v2067_v59 }
 0x1c5   :  { %v812_v4 = vsub.f32 %v1983_v46, %v2067_v59  ;;  %v837_v15 = vsub.f32 %v1905_v51, %v2067_v59  ;;  %1341 = vpow2.f32 %v889_v20  ;;  %v862_v30 = vsub.f32 %v1907_v52, %v2067_v59 }
 0x1c6   :  { %v2081_v41 = vadd.f32 %v1332_v50, %v875_v25  ;;  %v887_v47 = vsub.f32 %v1992_v53, %v2067_v59  ;;  %v793_v3 = vmul.f32 1.442695, %v787_v23  ;;  %v912_v40 = vsub.f32 %v2032_v28, %v2067_v59 }
 0x1c7   :  { %v1334_v0 = vpop.eup %1333  ;;  %v818_v12 = vmul.f32 1.442695, %v812_v4  ;;  %v843_v14 = vmul.f32 1.442695, %v837_v15  ;;  %1343 = vpow2.f32 %v914_v26  ;;  %v868_v51 = vmul.f32 1.442695, %v862_v30 }
 0x1c8   :  { %v1336_v46 = vpop.eup %1335  ;;  %v802_v63 = vmul.f32 %v1334_v0, %v1998_v60  ;;  %v937_v16 = vsub.f32 %v1966_v49, %v2067_v59  ;;  %1345 = vpow2.f32 %v793_v3  ;;  %v893_v53 = vmul.f32 1.442695, %v887_v47 }
 0x1c9   :  { %v1338_v31 = vpop.eup %1337  ;;  %v822_v52 = vadd.f32 %v1336_v46, %v1334_v0  ;;  %v827_v17 = vmul.f32 %v1336_v46, %v2012_v42  ;;  %1347 = vpow2.f32 %v818_v12  ;;  %v918_v43 = vmul.f32 1.442695, %v912_v40 }
 0x1ca   :  { %v786_v9 = vsub.f32 %v1975_v39, %v2072_v5  ;;  %v905_v28 = vmul.f32 %v1332_v50, %v2027_v36  ;;  %v2096_v24 = vpop.eup %1339  ;;  %1349 = vpow2.f32 %v843_v14  ;;  %v943_v10 = vmul.f32 1.442695, %v937_v16 }
 0x1cb   :  { %v847_v57 = vadd.f32 %v1338_v31, %v822_v52  ;;  %v811_v49 = vsub.f32 %v1995_v37, %v2072_v5  ;;  %v2100_v44 = vpop.eup %1341  ;;  %1351 = vpow2.f32 %v868_v51  ;;  %v836_v20 = vsub.f32 %v2037_v8, %v2072_v5 }
 0x1cc   :  { %v791_v58 = vmul.f32 1.442695, %v786_v9  ;;  %v861_v39 = vsub.f32 %v1962_v7, %v2072_v5  ;;  %v831_v2 = vadd.f32 %v827_v17, %v802_v63  ;;  %1353 = vpow2.f32 %v893_v53 }
 0x1cd   :  { %v872_v21 = vadd.f32 %v2096_v24, %v847_v57  ;;  %v816_v50 = vmul.f32 1.442695, %v811_v49  ;;  %v2107_v19 = vpop.eup %1343  ;;  %1355 = vpow2.f32 %v918_v43  ;;  %v841_v13 = vmul.f32 1.442695, %v836_v20 }
 0x1ce   :  { %v866_v37 = vmul.f32 1.442695, %v861_v39  ;;  %v886_v32 = vsub.f32 %v1985_v48, %v2072_v5  ;;  %v1346_v26 = vpop.eup %1345  ;;  %1357 = vpow2.f32 %v943_v10  ;;  %v911_v7 = vsub.f32 %v2001_v38, %v2072_v5 }
 0x1cf   :  { %v897_v25 = vadd.f32 %v2100_v44, %v872_v21  ;;  %v884_v8 = vadd.f32 %v880_v56, %v859_v11  ;;  %v1348_v23 = vpop.eup %1347  ;;  %v852_v4 = vmul.f32 %v1338_v31, %v2021_v29  ;;  %1359 = vpow2.f32 %v791_v58 }
 0x1d0   :  { %v891_v15 = vmul.f32 1.442695, %v886_v32  ;;  %v804_v30 = vmul.f32 %v1346_v26, %v1998_v60  ;;  %v1350_v47 = vpop.eup %1349  ;;  %v824_v48 = vadd.f32 %v1348_v23, %v1346_v26  ;;  %1361 = vpow2.f32 %v816_v50 }
 0x1d1   :  { %v2117_v0 = vadd.f32 %v2107_v19, %v897_v25  ;;  %v916_v3 = vmul.f32 1.442695, %v911_v7  ;;  %v1352_v12 = vpop.eup %1351  ;;  %v856_v14 = vadd.f32 %v852_v4, %v831_v2  ;;  %1363 = vpow2.f32 %v841_v13 }
 0x1d2   :  { %v2119_v40 = vadd.f32 %v905_v28, %v884_v8  ;;  %v829_v38 = vmul.f32 %v1348_v23, %v2012_v42  ;;  %v1354_v11 = vpop.eup %1353  ;;  %v849_v56 = vadd.f32 %v1350_v47, %v824_v48  ;;  %1365 = vpow2.f32 %v866_v37 }
 0x1d3   :  { %v2123_v46 = vperm.slane %v1971_v6, 7  ;;  %v962_v63 = vsub.f32 %v1947_v61, %v2067_v59  ;;  %v1356_v51 = vpop.eup %1355  ;;  %1367 = vpow2.f32 %v891_v15  ;;  %v854_v31 = vmul.f32 %v1350_v47, %v2021_v29 }
 0x1d4   :  { %v833_v16 = vadd.f32 %v829_v38, %v804_v30  ;;  %v936_v52 = vsub.f32 %v1959_v1, %v2072_v5  ;;  %v1358_v17 = vpop.eup %1357  ;;  %v874_v53 = vadd.f32 %v1352_v12, %v849_v56  ;;  %1369 = vpow2.f32 %v916_v3 }
 0x1d5   :  { %v879_v43 = vmul.f32 %v1352_v12, %v2024_v27  ;;  %v968_v9 = vmul.f32 1.442695, %v962_v63  ;;  %v1360_v28 = vpop.eup %1359  ;;  %1371 = vpow2.f32 %v2034_v55  ;;  %v904_v61 = vmul.f32 %v1354_v11, %v2027_v36 }
 0x1d6   :  { %v858_v6 = vadd.f32 %v854_v31, %v833_v16  ;;  %v941_v59 = vmul.f32 1.442695, %v936_v52  ;;  %v1362_v57 = vpop.eup %1361  ;;  %v899_v10 = vadd.f32 %v1354_v11, %v874_v53  ;;  %v803_v49 = vmul.f32 %v1360_v28, %v1998_v60 }
 0x1d7   :  { %1373 = vpow2.f32 %v2039_v45  ;;  %v961_v1 = vsub.f32 %v1943_v35, %v2072_v5  ;;  %v1364_v58 = vpop.eup %1363  ;;  %v823_v20 = vadd.f32 %v1362_v57, %v1360_v28  ;;  %v828_v39 = vmul.f32 %v1362_v57, %v2012_v42 }
 0x1d8   :  { %1375 = vpow2.f32 %v2041_v62  ;;  %v883_v55 = vadd.f32 %v879_v43, %v858_v6  ;;  %v1366_v2 = vpop.eup %1365  ;;  %v924_v21 = vadd.f32 %v1356_v51, %v899_v10  ;;  %v853_v50 = vmul.f32 %v1364_v58, %v2021_v29 }
 0x1d9   :  { %v929_v13 = vmul.f32 %v1356_v51, %v2061_v18  ;;  %1377 = vpow2.f32 %v968_v9  ;;  %v1368_v60 = vpop.eup %1367  ;;  %v832_v37 = vadd.f32 %v828_v39, %v803_v49  ;;  %v848_v45 = vadd.f32 %v1364_v58, %v823_v20 }
 0x1da   :  { %v908_v32 = vadd.f32 %v904_v61, %v883_v55  ;;  %v966_v26 = vmul.f32 1.442695, %v961_v1  ;;  %v1370_v35 = vpop.eup %1369  ;;  %v949_v5 = vadd.f32 %v1358_v17, %v924_v21  ;;  %v954_v25 = vmul.f32 %v1358_v17, %v2070_v33 }
 0x1db   :  { %v878_v42 = vmul.f32 %v1366_v2, %v2024_v27  ;;  %v877_v62 = vmul.f32 %v2096_v24, %v2024_v27  ;;  %v1372_v7 = vpop.eup %1371  ;;  %v857_v8 = vadd.f32 %v853_v50, %v832_v37  ;;  %v873_v29 = vadd.f32 %v1366_v2, %v848_v45 }
 0x1dc   :  { %v933_v23 = vadd.f32 %v929_v13, %v908_v32  ;;  %1379 = vpow2.f32 %v941_v59  ;;  %v925_v15 = vadd.f32 %v1372_v7, %v2081_v41  ;;  %v930_v30 = vmul.f32 %v1372_v7, %v2061_v18 }
 0x1dd   :  { %v1374_v4 = vpop.eup %1373  ;;  %v903_v47 = vmul.f32 %v1368_v60, %v2027_v36  ;;  %v881_v48 = vadd.f32 %v877_v62, %v856_v14  ;;  %v898_v12 = vadd.f32 %v1368_v60, %v873_v29  ;;  %v882_v11 = vadd.f32 %v878_v42, %v857_v8 }
 0x1de   :  { %v1376_v3 = vpop.eup %1375  ;;  %v958_v38 = vadd.f32 %v954_v25, %v933_v23  ;;  %1381 = vpow2.f32 %v966_v26  ;;  %v934_v27 = vadd.f32 %v930_v30, %v2119_v40  ;;  %v950_v24 = vadd.f32 %v1374_v4, %v925_v15 }
 0x1df   :  { %v1378_v56 = vpop.eup %1377  ;;  %v955_v63 = vmul.f32 %v1374_v4, %v2070_v33  ;;  %v902_v51 = vmul.f32 %v2100_v44, %v2027_v36  ;;  %v923_v41 = vadd.f32 %v1370_v35, %v898_v12  ;;  %v907_v52 = vadd.f32 %v903_v47, %v882_v11 }
 0x1e0   :  { %v974_v16 = vadd.f32 %v1378_v56, %v949_v5  ;;  %v979_v31 = vmul.f32 %v1378_v56, %v2123_v46  ;;  %v975_v17 = vadd.f32 %v1376_v3, %v950_v24  ;;  %v980_v53 = vmul.f32 %v1376_v3, %v2123_v46 }
 0x1e1   :  { %v959_v14 = vadd.f32 %v955_v63, %v934_v27  ;;  %v906_v43 = vadd.f32 %v902_v51, %v881_v48  ;;  %v928_v40 = vmul.f32 %v1370_v35, %v2061_v18  ;;  %v927_v36 = vmul.f32 %v2107_v19, %v2061_v18 }
 0x1e2   :  { %v1380_v9 = vpop.eup %1379  ;;  %v983_v28 = vadd.f32 %v979_v31, %v958_v38  ;;  %1383 = vrcp.f32 %v974_v16  ;;  %v935_v49 = vsub.f32 %v1928_v54, %v2029_v34  ;;  %v960_v39 = vsub.f32 %v1921_v22, %v2029_v34 }
 0x1e3   :  { %v984_v6 = vadd.f32 %v980_v53, %v959_v14  ;;  %1385 = vrcp.f32 %v975_v17  ;;  %v932_v59 = vadd.f32 %v928_v40, %v907_v52  ;;  %v948_v44 = vadd.f32 %v1380_v9, %v923_v41 }
 0x1e4   :  { %v1382_v61 = vpop.eup %1381  ;;  %v953_v57 = vmul.f32 %v1380_v9, %v2070_v33  ;;  %v931_v10 = vadd.f32 %v927_v36, %v906_v43  ;;  %v939_v2 = vmul.f32 1.442695, %v935_v49  ;;  %v964_v60 = vmul.f32 1.442695, %v960_v39  ;;  %v1045_v36 = vld [vmem:[%s2218_s5] sm:$0xff]  ;;  %v1066_v39 = vpop.permute.xlu0 %1065 }
 0x1e5   :  { %v2160_v58 = vadd.f32 %v1382_v61, %v948_v44  ;;  %v978_v20 = vmul.f32 %v1382_v61, %v2123_v46  ;;  %v1036_v37 = vand.u32 2147483647, %v975_v17  ;;  %v1022_v45 = vand.u32 2147483647, %v974_v16  ;;  %v1046_v44 = vld [vmem:[%s2218_s5 + $0x8] sm:$0xff] }
 0x1e6   :  { %v957_v1 = vadd.f32 %v953_v57, %v932_v59  ;;  %v1024_v32 = vand.u32 2147483648, %v974_v16  ;;  %v1038_v26 = vand.u32 2147483648, %v975_v17  ;;  %vm1032_vm4 = vweird.f32 %v975_v17  ;;  %v1047_v57 = vld [vmem:[%s2218_s5 + $0x10] sm:$0xff] }
 0x1e7   :  { %1387 = vrcp.f32 %v2160_v58  ;;  %vm1018_vm5 = vweird.f32 %v974_v16  ;;  %vm1023_vm7 = vcmp.eq.f32.partialorder %v1022_v45, 8.507059e+37  ;;  %vm1037_vm9 = vcmp.eq.f32.partialorder %v1036_v37, 8.507059e+37 }
 0x1e8   :  { %v1384_v55 = vpop.eup %1383  ;;  %v982_v18 = vadd.f32 %v978_v20, %v957_v1  ;;  %1389 = vpow2.f32 %v939_v2  ;;  %v1025_v42 = vor.u32 1.1754944e-38, %v1024_v32  ;;  %v1039_v8 = vor.u32 1.1754944e-38, %v1038_v26  ;;  %v1071_v20 = vpop.permute.xlu2 %1070  ;;  %v1118_v32 = vld [vmem:[%s2220_s7] sm:$0xff]  ;;  %v1119_v26 = vld [vmem:[%s2220_s7 + $0x8] sm:$0xff] }
 0x1e9   :  { %v1386_v21 = vpop.eup %1385  ;;  %v1014_v50 = vmul.f32 %v1384_v55, %v974_v16  ;;  %vm1019_vm2 = vweird.f32 %v1384_v55  ;;  %1391 = vpow2.f32 %v964_v60  ;;  %v1008_v23 = vand.u32 2147483647, %v2160_v58 }
 0x1ea   :  { %v1028_v19 = vmul.f32 %v1386_v21, %v975_v17  ;;  %vm1033_vm3 = vweird.f32 %v1386_v21  ;;  %vm1020_vm6 = vmor %vm1018_vm5, %vm1019_vm2  ;;  %v1010_v38 = vand.u32 2147483648, %v2160_v58  ;;  %vm1004_vm11 = vweird.f32 %v2160_v58 }
 0x1eb   :  { %v1015_v13 = vsub.f32 1.0, %v1014_v50  ;;  %vm1034_vm8 = vmor %vm1032_vm4, %vm1033_vm3  ;;  %vm1009_vm13 = vcmp.eq.f32.partialorder %v1008_v23, 8.507059e+37  ;;  %v1061_v50 = vpop.permute.xlu1 %1060 }
 0x1ec   :  { %v1029_v54 = vsub.f32 1.0, %v1028_v19 }
 0x1ed   :  { %v1016_v35 = vmul.f32 %v1384_v55, %v1015_v13  ;;  %v1388_v34 = vpop.eup %1387 }
 0x1ee   :  { %v1030_v22 = vmul.f32 %v1386_v21, %v1029_v54  ;;  %v1000_v62 = vmul.f32 %v1388_v34, %v2160_v58  ;;  %v1390_v7 = vpop.eup %1389  ;;  %vm1005_vm10 = vweird.f32 %v1388_v34 }
 0x1ef   :  { %v1017_v5 = vadd.f32 %v1384_v55, %v1016_v35  ;;  %v947_v47 = vadd.f32 %v1390_v7, %v2117_v0  ;;  %v1392_v48 = vpop.eup %1391  ;;  %v952_v11 = vmul.f32 %v1390_v7, %v2070_v33  ;;  %vm1006_vm12 = vmor %vm1004_vm11, %vm1005_vm10  ;;  %v1011_v0 = vor.u32 1.1754944e-38, %v1010_v38  ;;  %v1120_v35 = vld [vmem:[%s2220_s7 + $0x10] sm:$0xff]  ;;  %v1191_v38 = vld [vmem:[%s2222_s9] sm:$0x1] }
 0x1f0   :  { %v1031_v25 = vadd.f32 %v1386_v21, %v1030_v22  ;;  %v1001_v30 = vsub.f32 1.0, %v1000_v62  ;;  %v977_v51 = vmul.f32 %v1392_v48, %v2123_v46  ;;  %v1056_v13 = vpop.permute.xlu2 %1055  ;;  %v1121_v22 = vld [vmem:[%s2220_s7 + $0x18] sm:$0xff] }
 0x1f1   :  { %v1021_v29 = vsel %vm1020_vm6, %v1384_v55, %v1017_v5  ;;  %v972_v24 = vadd.f32 %v1392_v48, %v947_v47  ;;  %v956_v63 = vadd.f32 %v952_v11, %v931_v10  ;;  %v1048_v10 = vld [vmem:[%s2218_s5 + $0x18] sm:$0xff] }
 0x1f2   :  { %v1035_v4 = vsel %vm1034_vm8, %v1386_v21, %v1031_v25  ;;  %v1026_v15 = vsel %vm1023_vm7, %v1025_v42, %v1021_v29  ;;  %v1002_v27 = vmul.f32 %v1388_v34, %v1001_v30  ;;  %v1144_v42 = vpop.permute.xlu0 %1143 }
 0x1f3   :  { %v1040_v3 = vsel %vm1037_vm9, %v1039_v8, %v1035_v4  ;;  %v1043_v12 = vmul.f32 %v1026_v15, %v983_v28  ;;  %1393 = vrcp.f32 %v972_v24  ;;  %v981_v16 = vadd.f32 %v977_v51, %v956_v63  ;;  %v1139_v62 = vpop.permute.xlu1 %1138 }
 0x1f4   :  { %v1044_v56 = vmul.f32 %v1040_v3, %v984_v6  ;;  %v1003_v41 = vadd.f32 %v1388_v34, %v1002_v27  ;;  %v996_v43 = vand.u32 2147483648, %v972_v24  ;;  %v994_v46 = vand.u32 2147483647, %v972_v24 }
 0x1f5   :  { %vm990_vm15 = vweird.f32 %v972_v24 }
 0x1f6   :  { %1097 = vmatpush.msrb.mxu3 %v1044_v56  ;;  %v1007_v31 = vsel %vm1006_vm12, %v1388_v34, %v1003_v41  ;;  %v997_v40 = vor.u32 1.1754944e-38, %v996_v43  ;;  %vm995_vm2 = vcmp.eq.f32.partialorder %v994_v46, 8.507059e+37 }
 0x1f7   :  { %v1012_v52 = vsel %vm1009_vm13, %v1011_v0, %v1007_v31 }
 0x1f8   :  { %1098 = vmatpush.msrb.mxu3 %v1043_v12  ;;  %v1042_v33 = vmul.f32 %v1012_v52, %v982_v18  ;;  %v1134_v23 = vpop.permute.xlu2 %1133 }
 0x1f9   :  { %v1394_v14 = vpop.eup %1393 }
 0x1fa   :  { %1099 = vmatpush.msrb.mxu3 %v1042_v33  ;;  %v986_v17 = vmul.f32 %v1394_v14, %v972_v24  ;;  %vm991_vm14 = vweird.f32 %v1394_v14  ;;  %v1129_v30 = vpop.permute.xlu0 %1128  ;;  %v2230_v24 = vld [vmem:[#allocation7_spill] sm:$0xff] }
 0x1fb   :  { %vm992_vm1 = vmor %vm990_vm15, %vm991_vm14  ;;  %v1219_v11 = vpop.permute.xlu1 %1218 }
 0x1fc   :  { %v987_v53 = vsub.f32 1.0, %v986_v17  ;;  %v1221_v27 = vperm.slane %v1219_v11, 0 }
 0x1fe   :  { %v988_v9 = vmul.f32 %v1394_v14, %v987_v53 }
 0x200   :  { %v989_v28 = vadd.f32 %v1394_v14, %v988_v9 }
 0x202   :  { %v993_v6 = vsel %vm992_vm1, %v1394_v14, %v989_v28 }
 0x203   :  { %v998_v61 = vsel %vm995_vm2, %v997_v40, %v993_v6 }
 0x204   :  { %v1041_v59 = vmul.f32 %v998_v61, %v981_v16 }
 0x206   :  { %1100 = vmatpush.msrb.mxu3 %v1041_v59 }
 0x207   :  { %1285 = vmatmul.msk.f32.vlgmr.msrb.gmra.mxu3 %vm133_vm0, %v1045_v36 }
 0x20f   :  { %1286 = vmatmul.msk.f32.gmra.mxu3 %vm133_vm0, %v1046_v44 }
 0x217   :  { %1287 = vmatmul.msk.f32.gmra.mxu3 %vm133_vm0, %v1047_v57 }
 0x21f   :  { %1288 = vmatmul.msk.f32.gmra.mxu3 %vm133_vm0, %v1048_v10 }
 0x28a   :  { %v1102_v49 = vpop.f32.mrf.mxu3 }
 0x28b   :  { %v1103_v60 = vadd.f32 %v1102_v49, %v1056_v13 }
 0x28d   :  { %v1114_v45 = vmax.f32 %v1103_v60, 0.0 }
 0x292   :  { %v1105_v1 = vpop.f32.mrf.mxu3 }
 0x293   :  { %v1106_v18 = vadd.f32 %v1105_v1, %v1061_v50 }
 0x295   :  { %v1115_v37 = vmax.f32 %v1106_v18, 0.0 }
 0x29a   :  { %v1108_v58 = vpop.f32.mrf.mxu3 }
 0x29b   :  { %v1109_v2 = vadd.f32 %v1108_v58, %v1066_v39 }
 0x29d   :  { %v1116_v54 = vmax.f32 %v1109_v2, 0.0 }
 0x2a2   :  { %v1111_v55 = vpop.f32.mrf.mxu3 }
 0x2a3   :  { %v1112_v21 = vadd.f32 %v1111_v55, %v1071_v20 }
 0x2a5   :  { %v1117_v19 = vmax.f32 %v1112_v21, 0.0 }
 0x2a7   :  { %1170 = vmatpush.msra.mxu1 %v1117_v19 }
 0x2a9   :  { %1171 = vmatpush.msra.mxu1 %v1116_v54 }
 0x2ab   :  { %1172 = vmatpush.msra.mxu1 %v1115_v37 }
 0x2ad   :  { %1173 = vmatpush.msra.mxu1 %v1114_v45 }
 0x2ae   :  { %1289 = vmatmul.msk.f32.vlgmr.msra.gmra.mxu1 %vm133_vm0, %v1118_v32 }
 0x2b6   :  { %1290 = vmatmul.msk.f32.gmra.mxu1 %vm133_vm0, %v1119_v26 }
 0x2be   :  { %1291 = vmatmul.msk.f32.gmra.mxu1 %vm133_vm0, %v1120_v35 }
 0x2c6   :  { %1292 = vmatmul.msk.f32.gmra.mxu1 %vm133_vm0, %v1121_v22 }
 0x32b   :  { %v1175_v34 = vpop.f32.mrf.mxu1 }
 0x32c   :  { %v1176_v47 = vadd.f32 %v1175_v34, %v1129_v30 }
 0x32e   :  { %v1187_v12 = vmax.f32 %v1176_v47, 0.0 }
 0x333   :  { %v1178_v5 = vpop.f32.mrf.mxu1 }
 0x334   :  { %v1179_v4 = vadd.f32 %v1178_v5, %v1134_v23 }
 0x336   :  { %v1188_v3 = vmax.f32 %v1179_v4, 0.0 }
 0x33b   :  { %v1181_v25 = vpop.f32.mrf.mxu1 }
 0x33c   :  { %v1182_v8 = vadd.f32 %v1181_v25, %v1139_v62 }
 0x33e   :  { %v1189_v48 = vmax.f32 %v1182_v8, 0.0 }
 0x343   :  { %v1184_v7 = vpop.f32.mrf.mxu1 }
 0x344   :  { %v1185_v29 = vadd.f32 %v1184_v7, %v1144_v42 }
 0x346   :  { %v1190_v15 = vmax.f32 %v1185_v29, 0.0 }
 0x348   :  { %1207 = vmatpush.msra.mxu3 %v1190_v15 }
 0x34a   :  { %1208 = vmatpush.msra.mxu3 %v1189_v48 }
 0x34c   :  { %1209 = vmatpush.msra.mxu3 %v1188_v3 }
 0x34e   :  { %1210 = vmatpush.msra.mxu3 %v1187_v12 }
 0x34f   :  { %1293 = vmatmul.msk.f32.vlgmr.msra.gmra.mxu3 %vm133_vm0, %v1191_v38 }
 0x3d2   :  { %v1212_v56 = vpop.f32.mrf.mxu3 }
 0x3d3   :  { %v1213_v63 = vadd.f32 %v1212_v56, %v2230_v24 }
 0x3d5   :  { %v1222_v51 = vadd.f32 %v1221_v27, %v1213_v63 }
 0x3d7   :  { %1223 = vst [vmem:[#allocation4] sm:$0x1] %v1222_v51 }
 0x3d8   :  { %1234 = dma.vmem_to_hbm [thread:$0]  %s1230_s24, 16, %s1232_s27, [#allocation5]  }
 0x3d9   :  { %1419 = dma.done.wait [#allocation5], 16  }
 0x3da   :  { %1420 = vsyncadd [#allocation5], 4294967280 }
 0x3db   :  { %1239 = vsyncpa [#allocation5], 1 }

</bundles_post_ra>
